<compile_context>
chip_gen: v6e
topology: v6e:2x2x1
jax: 0.10.0
libtpu: 0.0.40
codegen_flags: <defaults>
</compile_context>

<pallas_src>
import math

import jax
import jax.numpy as jnp
from jax.experimental import pallas as pl
from jax.experimental.pallas import tpu as pltpu


# ---------------------------------------------------------------------------
# Fused kernel: one (tm, K1) row tile of the G1 input produces the three xyz
# outputs; feat1/feat2 live only in registers/VMEM.
# Ref order:
#   x1,
#   G1: w1, b1, w2, b2, w3p, b3p                 (w3p/b3p padded to 128 cols)
#   G2: w1x, w1f, b1, w2, b2, w3p, b3p           (w1 split: xyz rows / feat rows)
#   G3: w1x, w1f2, w1f1, b1, w2, b2, w3p, b3p
#   out1, out2, out3
# ---------------------------------------------------------------------------
def generator_chain_kernel(
        x1_ref,
        g1w1_ref, g1b1_ref, g1w2_ref, g1b2_ref, g1w3_ref, g1b3_ref,
        g2w1x_ref, g2w1f_ref, g2b1_ref, g2w2_ref, g2b2_ref, g2w3_ref, g2b3_ref,
        g3w1x_ref, g3w1f2_ref, g3w1f1_ref, g3b1_ref, g3w2_ref, g3b2_ref,
        g3w3_ref, g3b3_ref,
        out1_ref, out2_ref, out3_ref):
    f32 = jnp.float32
    bf16 = jnp.bfloat16

    # ---------------- G1 ----------------
    h = jnp.dot(x1_ref[...], g1w1_ref[...], preferred_element_type=f32)
    h = jnp.maximum(h + g1b1_ref[...], 0.0)
    f1 = jnp.dot(h.astype(bf16), g1w2_ref[...], preferred_element_type=f32)
    f1 = jnp.maximum(f1 + g1b2_ref[...], 0.0)
    y1 = jnp.dot(f1.astype(bf16), g1w3_ref[...], preferred_element_type=f32)
    y1 = y1 + g1b3_ref[...]                  # (tm, 128); cols 3.. exactly zero
    out1_ref[...] = y1[:, :3].astype(out1_ref.dtype)

    f1b = f1.astype(bf16)

    # ---------------- G2: input = [xyz1 | feat1] via split weights ----------
    h = (jnp.dot(y1.astype(bf16), g2w1x_ref[...], preferred_element_type=f32)
         + jnp.dot(f1b, g2w1f_ref[...], preferred_element_type=f32))
    h = jnp.maximum(h + g2b1_ref[...], 0.0)
    f2 = jnp.dot(h.astype(bf16), g2w2_ref[...], preferred_element_type=f32)
    f2 = jnp.maximum(f2 + g2b2_ref[...], 0.0)
    y2 = jnp.dot(f2.astype(bf16), g2w3_ref[...], preferred_element_type=f32)
    y2 = y2 + g2b3_ref[...]
    out2_ref[...] = y2[:, :3].astype(out2_ref.dtype)

    # ---------------- G3: input = [xyz2 | feat2 | feat1] --------------------
    h = (jnp.dot(y2.astype(bf16), g3w1x_ref[...], preferred_element_type=f32)
         + jnp.dot(f2.astype(bf16), g3w1f2_ref[...], preferred_element_type=f32)
         + jnp.dot(f1b, g3w1f1_ref[...], preferred_element_type=f32))
    h = jnp.maximum(h + g3b1_ref[...], 0.0)
    f3 = jnp.dot(h.astype(bf16), g3w2_ref[...], preferred_element_type=f32)
    f3 = jnp.maximum(f3 + g3b2_ref[...], 0.0)
    y3 = jnp.dot(f3.astype(bf16), g3w3_ref[...], preferred_element_type=f32)
    y3 = y3 + g3b3_ref[...]
    out3_ref[...] = y3[:, :3].astype(out3_ref.dtype)


# ---------------------------------------------------------------------------
# Helpers
# ---------------------------------------------------------------------------
def _round_up(x, m):
    return ((x + m - 1) // m) * m


def _num_tensorcores():
    """2 on dual-TensorCore v7x, 1 on v5e/v6e (safe fallback)."""
    try:
        kind = jax.devices()[0].device_kind.lower()
    except Exception:
        return 1
    return 2 if ("v7" in kind or "7x" in kind) else 1


def _choose_tile_m(m_total, tile_m, n_cores):
    """Big tiles amortize the ~0.35us per-grid-step overhead.  Only cap to
    >=n_cores grid steps when there is more than one TensorCore to feed."""
    tm = tile_m
    if n_cores > 1:
        tm = min(tm, max(16, pl.cdiv(m_total, n_cores)))
    tm = min(tm, _round_up(m_total, 16))
    return max(16, _round_up(tm, 16))          # bf16 sublane packing


def _pad_last_layer(w3, b3, hid):
    """Zero-pad fc3 to 128 output columns so the MXU pass is lane-dense; the
    padded columns are exactly zero (zero weights + zero bias)."""
    w3p = jnp.pad(w3, ((0, 0), (0, hid - w3.shape[1])))
    b3p = jnp.pad(b3, (0, hid - b3.shape[0]))
    return w3p, b3p


def _prep_stage1(params, hid):
    w1, b1, w2, b2, w3, b3 = params
    k = w1.shape[0]
    k_pad = _round_up(k, 16)
    if k_pad != k:
        w1 = jnp.pad(w1, ((0, k_pad - k), (0, 0)))
    w3p, b3p = _pad_last_layer(w3, b3, hid)
    return (w1.astype(jnp.bfloat16),
            b1.reshape(1, hid).astype(jnp.float32),
            w2.astype(jnp.bfloat16),
            b2.reshape(1, hid).astype(jnp.float32),
            w3p.astype(jnp.bfloat16),
            b3p.reshape(1, hid).astype(jnp.float32)), k_pad


def _prep_stage2(params, hid):
    w1, b1, w2, b2, w3, b3 = params            # w1: (3 + hid, hid)
    w1x = jnp.pad(w1[:3], ((0, hid - 3), (0, 0)))   # xyz rows, zero-padded
    w1f = w1[3:3 + hid]
    w3p, b3p = _pad_last_layer(w3, b3, hid)
    return (w1x.astype(jnp.bfloat16), w1f.astype(jnp.bfloat16),
            b1.reshape(1, hid).astype(jnp.float32),
            w2.astype(jnp.bfloat16), b2.reshape(1, hid).astype(jnp.float32),
            w3p.astype(jnp.bfloat16), b3p.reshape(1, hid).astype(jnp.float32))


def _prep_stage3(params, hid):
    w1, b1, w2, b2, w3, b3 = params            # w1: (3 + 2*hid, hid)
    w1x = jnp.pad(w1[:3], ((0, hid - 3), (0, 0)))
    w1f2 = w1[3:3 + hid]
    w1f1 = w1[3 + hid:3 + 2 * hid]
    w3p, b3p = _pad_last_layer(w3, b3, hid)
    return (w1x.astype(jnp.bfloat16), w1f2.astype(jnp.bfloat16),
            w1f1.astype(jnp.bfloat16),
            b1.reshape(1, hid).astype(jnp.float32),
            w2.astype(jnp.bfloat16), b2.reshape(1, hid).astype(jnp.float32),
            w3p.astype(jnp.bfloat16), b3p.reshape(1, hid).astype(jnp.float32))


# ---------------------------------------------------------------------------
# Wrapper: fused G1 -> G2 -> G3 chain.
# ---------------------------------------------------------------------------
def generator_foldingnet_chain(x1, g1_params, g2_params, g3_params, *,
                               tile_m=1024):
    """x1: (..., indim1) f32.  Returns (x_init, x_interm, x_fine), each
    (..., 3) f32.  feat1/feat2 remain in VMEM; stage-2/3 inputs are
    [xyz | feat...] realized through split first-layer weights."""
    hid = g1_params[0].shape[1]
    lead = x1.shape[:-1]
    m_total = math.prod(lead) if lead else 1
    k1 = x1.shape[-1]

    g1p, k1_pad = _prep_stage1(g1_params, hid)
    g2p = _prep_stage2(g2_params, hid)
    g3p = _prep_stage3(g3_params, hid)

    x2d = x1.reshape(m_total, k1).astype(jnp.bfloat16)
    if k1_pad != k1:
        x2d = jnp.pad(x2d, ((0, 0), (0, k1_pad - k1)))   # sublane-clean K

    n_cores = _num_tensorcores()
    tm = _choose_tile_m(m_total, tile_m, n_cores)
    grid = (pl.cdiv(m_total, tm),)          # partial last block: masked writes

    row = lambda i: (i, 0)
    const = lambda i: (0, 0)

    in_specs = [pl.BlockSpec((tm, k1_pad), row)]
    for arr in (*g1p, *g2p, *g3p):          # VMEM-resident for the whole grid
        in_specs.append(pl.BlockSpec(arr.shape, const))

    out_specs = [pl.BlockSpec((tm, 3), row) for _ in range(3)]
    out_shape = [jax.ShapeDtypeStruct((m_total, 3), jnp.float32)
                 for _ in range(3)]

    flops = 2 * m_total * (k1_pad * hid + 11 * hid * hid)
    bytes_accessed = int(
        x2d.size * 2
        + sum(a.size * a.dtype.itemsize for a in (*g1p, *g2p, *g3p))
        + 3 * m_total * 3 * 4)
    cost = pl.CostEstimate(flops=flops, transcendentals=0,
                           bytes_accessed=bytes_accessed)

    out1, out2, out3 = pl.pallas_call(
        generator_chain_kernel,
        out_shape=out_shape,
        grid_spec=pltpu.PrefetchScalarGridSpec(
            num_scalar_prefetch=0,
            grid=grid,
            in_specs=in_specs,
            out_specs=out_specs),
        compiler_params=pltpu.CompilerParams(
            dimension_semantics=("parallel",)),
        cost_estimate=cost,
    )(x2d, *g1p, *g2p, *g3p)

    return (out1.reshape(*lead, 3),
            out2.reshape(*lead, 3),
            out3.reshape(*lead, 3))


# ---------------------------------------------------------------------------
# Deterministic init + pure-JAX reference (module semantics: per-stage concat;
# mirrors the kernel's bf16-input / f32-accumulate MXU math).
# ---------------------------------------------------------------------------
def init_foldingnet(indim, key, hid=128, out_dim=3):
    dims = [indim, hid, hid, out_dim]
    params = []
    for layer in range(3):
        fan_in, fan_out = dims[layer], dims[layer + 1]
        key, kw, kb = jax.random.split(key, 3)
        bound = 1.0 / math.sqrt(fan_in)
        w = jax.random.uniform(kw, (fan_in, fan_out), jnp.float32, -bound, bound)
        b = jax.random.uniform(kb, (fan_out,), jnp.float32, -bound, bound)
        params += [w, b]
    return tuple(params)


def foldingnet_reference(x, params):
    w1, b1, w2, b2, w3, b3 = params
    h = jnp.dot(x.astype(jnp.bfloat16), w1.astype(jnp.bfloat16),
                preferred_element_type=jnp.float32) + b1
    h = jnp.maximum(h, 0.0)
    f = jnp.dot(h.astype(jnp.bfloat16), w2.astype(jnp.bfloat16),
                preferred_element_type=jnp.float32) + b2
    f = jnp.maximum(f, 0.0)
    y = jnp.dot(f.astype(jnp.bfloat16), w3.astype(jnp.bfloat16),
                preferred_element_type=jnp.float32) + b3
    return y, f


def chain_reference(x1, p1, p2, p3):
    y1, f1 = foldingnet_reference(x1, p1)
    x2 = jnp.concatenate([y1, f1], axis=-1)
    y2, f2 = foldingnet_reference(x2, p2)
    x3 = jnp.concatenate([y2, f2, f1], axis=-1)
    y3, _ = foldingnet_reference(x3, p3)
    return y1, y2, y3


if __name__ == "__main__":
    key = jax.random.PRNGKey(0)

    # Small GeneratorVAE-like shapes: batch=2, grid 8x8 -> N=64 points,
    # codeword dim 30 so G1's indim = 2 + 30 = 32; hidden = 128, xyz = 3.
    batch = 2
    N = 8 * 8
    codeword_dim = 30
    hid = 128
    g1_in = 2 + codeword_dim
    g2_in = 3 + hid            # [x_init | x_init_feat]
    g3_in = 3 + hid + hid      # [x_intermediate | x_interm_feat | x_init_feat]

    key, k1, k2, k3, kg, kc = jax.random.split(key, 6)
    p1 = init_foldingnet(g1_in, k1)
    p2 = init_foldingnet(g2_in, k2)
    p3 = init_foldingnet(g3_in, k3)

    grid2d = jax.random.uniform(kg, (batch, N, 2), jnp.float32)
    codeword = jax.random.normal(kc, (batch, 1, codeword_dim), jnp.float32)
    codeword = jnp.broadcast_to(codeword, (batch, N, codeword_dim))

    # TODO(synk): im_encoder, pointVAE and the gather-based bilinear
    # PointProjection are external / data-dependent modules not translated;
    # the fused kernel covers GeneratorVAE.forward's G1->G2->G3 FoldingNet
    # chain with the pixel-feature / pointVAE terms omitted.
    x1 = jnp.concatenate([grid2d, codeword], axis=2)

    x_init, x_interm, x_fine = generator_foldingnet_chain(x1, p1, p2, p3)
    x_init, x_interm, x_fine = jax.block_until_ready(
        (x_init, x_interm, x_fine))

    r_init, r_interm, r_fine = chain_reference(x1, p1, p2, p3)

    assert x_init.shape == (batch, N, 3)
    assert x_interm.shape == (batch, N, 3)
    assert x_fine.shape == (batch, N, 3)

    for got, ref in ((x_init, r_init), (x_interm, r_interm), (x_fine, r_fine)):
        err = float(jnp.max(jnp.abs(got - ref)))
        assert jnp.allclose(got, ref, atol=2e-3, rtol=2e-3), err

    print("KERNEL_OK")
</pallas_src>

<mosaic_0001>
module attributes {stable_mosaic.version = 11 : i64} {
  func.func @generator_chain_kernel(%arg0: i32, %arg1: memref<128x32xbf16, #tpu.memory_space<vmem>>, %arg2: memref<32x128xbf16, #tpu.memory_space<vmem>>, %arg3: memref<1x128xf32, #tpu.memory_space<vmem>>, %arg4: memref<128x128xbf16, #tpu.memory_space<vmem>>, %arg5: memref<1x128xf32, #tpu.memory_space<vmem>>, %arg6: memref<128x128xbf16, #tpu.memory_space<vmem>>, %arg7: memref<1x128xf32, #tpu.memory_space<vmem>>, %arg8: memref<128x128xbf16, #tpu.memory_space<vmem>>, %arg9: memref<128x128xbf16, #tpu.memory_space<vmem>>, %arg10: memref<1x128xf32, #tpu.memory_space<vmem>>, %arg11: memref<128x128xbf16, #tpu.memory_space<vmem>>, %arg12: memref<1x128xf32, #tpu.memory_space<vmem>>, %arg13: memref<128x128xbf16, #tpu.memory_space<vmem>>, %arg14: memref<1x128xf32, #tpu.memory_space<vmem>>, %arg15: memref<128x128xbf16, #tpu.memory_space<vmem>>, %arg16: memref<128x128xbf16, #tpu.memory_space<vmem>>, %arg17: memref<128x128xbf16, #tpu.memory_space<vmem>>, %arg18: memref<1x128xf32, #tpu.memory_space<vmem>>, %arg19: memref<128x128xbf16, #tpu.memory_space<vmem>>, %arg20: memref<1x128xf32, #tpu.memory_space<vmem>>, %arg21: memref<128x128xbf16, #tpu.memory_space<vmem>>, %arg22: memref<1x128xf32, #tpu.memory_space<vmem>>, %arg23: memref<128x3xf32, #tpu.memory_space<vmem>>, %arg24: memref<128x3xf32, #tpu.memory_space<vmem>>, %arg25: memref<128x3xf32, #tpu.memory_space<vmem>>) attributes {dimension_semantics = [#tpu.dimension_semantics<parallel>], iteration_bounds = array<i64: 1>, scalar_prefetch = 0 : i64, scratch_operands = 0 : i64, tpu.core_type = #tpu.core_type<tc>, window_params = [{transform_indices = @transform_0, window_bounds = array<i64: 128, 32>}, {pipeline_mode = #tpu.pipeline_mode<synchronous>, transform_indices = @transform_1, window_bounds = array<i64: 32, 128>}, {pipeline_mode = #tpu.pipeline_mode<synchronous>, transform_indices = @transform_2, window_bounds = array<i64: 1, 128>}, {pipeline_mode = #tpu.pipeline_mode<synchronous>, transform_indices = @transform_3, window_bounds = array<i64: 128, 128>}, {pipeline_mode = #tpu.pipeline_mode<synchronous>, transform_indices = @transform_4, window_bounds = array<i64: 1, 128>}, {pipeline_mode = #tpu.pipeline_mode<synchronous>, transform_indices = @transform_5, window_bounds = array<i64: 128, 128>}, {pipeline_mode = #tpu.pipeline_mode<synchronous>, transform_indices = @transform_6, window_bounds = array<i64: 1, 128>}, {pipeline_mode = #tpu.pipeline_mode<synchronous>, transform_indices = @transform_7, window_bounds = array<i64: 128, 128>}, {pipeline_mode = #tpu.pipeline_mode<synchronous>, transform_indices = @transform_8, window_bounds = array<i64: 128, 128>}, {pipeline_mode = #tpu.pipeline_mode<synchronous>, transform_indices = @transform_9, window_bounds = array<i64: 1, 128>}, {pipeline_mode = #tpu.pipeline_mode<synchronous>, transform_indices = @transform_10, window_bounds = array<i64: 128, 128>}, {pipeline_mode = #tpu.pipeline_mode<synchronous>, transform_indices = @transform_11, window_bounds = array<i64: 1, 128>}, {pipeline_mode = #tpu.pipeline_mode<synchronous>, transform_indices = @transform_12, window_bounds = array<i64: 128, 128>}, {pipeline_mode = #tpu.pipeline_mode<synchronous>, transform_indices = @transform_13, window_bounds = array<i64: 1, 128>}, {pipeline_mode = #tpu.pipeline_mode<synchronous>, transform_indices = @transform_14, window_bounds = array<i64: 128, 128>}, {pipeline_mode = #tpu.pipeline_mode<synchronous>, transform_indices = @transform_15, window_bounds = array<i64: 128, 128>}, {pipeline_mode = #tpu.pipeline_mode<synchronous>, transform_indices = @transform_16, window_bounds = array<i64: 128, 128>}, {pipeline_mode = #tpu.pipeline_mode<synchronous>, transform_indices = @transform_17, window_bounds = array<i64: 1, 128>}, {pipeline_mode = #tpu.pipeline_mode<synchronous>, transform_indices = @transform_18, window_bounds = array<i64: 128, 128>}, {pipeline_mode = #tpu.pipeline_mode<synchronous>, transform_indices = @transform_19, window_bounds = array<i64: 1, 128>}, {pipeline_mode = #tpu.pipeline_mode<synchronous>, transform_indices = @transform_20, window_bounds = array<i64: 128, 128>}, {pipeline_mode = #tpu.pipeline_mode<synchronous>, transform_indices = @transform_21, window_bounds = array<i64: 1, 128>}, {transform_indices = @transform_22, window_bounds = array<i64: 128, 3>}, {transform_indices = @transform_23, window_bounds = array<i64: 128, 3>}, {transform_indices = @transform_24, window_bounds = array<i64: 128, 3>}]} {
    %c0 = arith.constant 0 : index
    %c0_0 = arith.constant 0 : index
    %0 = vector.load %arg1[%c0, %c0_0] : memref<128x32xbf16, #tpu.memory_space<vmem>>, vector<128x32xbf16>
    %c0_1 = arith.constant 0 : index
    %c0_2 = arith.constant 0 : index
    %1 = vector.load %arg2[%c0_1, %c0_2] : memref<32x128xbf16, #tpu.memory_space<vmem>>, vector<32x128xbf16>
    %cst = arith.constant dense<0.000000e+00> : vector<128x128xf32>
    %2 = tpu.matmul %0, %1, %cst {dimension_numbers = #tpu.dot_dimension_numbers<[1], [0], [0], [1], [0, 0, 1, 1], [], []>} : vector<128x32xbf16>, vector<32x128xbf16>, vector<128x128xf32> -> vector<128x128xf32>
    %c0_3 = arith.constant 0 : index
    %c0_4 = arith.constant 0 : index
    %3 = vector.load %arg3[%c0_3, %c0_4] : memref<1x128xf32, #tpu.memory_space<vmem>>, vector<1x128xf32>
    %4 = vector.broadcast %3 : vector<1x128xf32> to vector<128x128xf32>
    %5 = arith.addf %2, %4 : vector<128x128xf32>
    %cst_5 = arith.constant 0.000000e+00 : f32
    %6 = vector.broadcast %cst_5 : f32 to vector<128x128xf32>
    %7 = arith.maximumf %5, %6 : vector<128x128xf32>
    %8 = arith.truncf %7 : vector<128x128xf32> to vector<128x128xbf16>
    %c0_6 = arith.constant 0 : index
    %c0_7 = arith.constant 0 : index
    %9 = vector.load %arg4[%c0_6, %c0_7] : memref<128x128xbf16, #tpu.memory_space<vmem>>, vector<128x128xbf16>
    %cst_8 = arith.constant dense<0.000000e+00> : vector<128x128xf32>
    %10 = tpu.matmul %8, %9, %cst_8 {dimension_numbers = #tpu.dot_dimension_numbers<[1], [0], [0], [1], [0, 0, 1, 1], [], []>} : vector<128x128xbf16>, vector<128x128xbf16>, vector<128x128xf32> -> vector<128x128xf32>
    %c0_9 = arith.constant 0 : index
    %c0_10 = arith.constant 0 : index
    %11 = vector.load %arg5[%c0_9, %c0_10] : memref<1x128xf32, #tpu.memory_space<vmem>>, vector<1x128xf32>
    %12 = vector.broadcast %11 : vector<1x128xf32> to vector<128x128xf32>
    %13 = arith.addf %10, %12 : vector<128x128xf32>
    %cst_11 = arith.constant 0.000000e+00 : f32
    %14 = vector.broadcast %cst_11 : f32 to vector<128x128xf32>
    %15 = arith.maximumf %13, %14 : vector<128x128xf32>
    %16 = arith.truncf %15 : vector<128x128xf32> to vector<128x128xbf16>
    %c0_12 = arith.constant 0 : index
    %c0_13 = arith.constant 0 : index
    %17 = vector.load %arg6[%c0_12, %c0_13] : memref<128x128xbf16, #tpu.memory_space<vmem>>, vector<128x128xbf16>
    %cst_14 = arith.constant dense<0.000000e+00> : vector<128x128xf32>
    %18 = tpu.matmul %16, %17, %cst_14 {dimension_numbers = #tpu.dot_dimension_numbers<[1], [0], [0], [1], [0, 0, 1, 1], [], []>} : vector<128x128xbf16>, vector<128x128xbf16>, vector<128x128xf32> -> vector<128x128xf32>
    %c0_15 = arith.constant 0 : index
    %c0_16 = arith.constant 0 : index
    %19 = vector.load %arg7[%c0_15, %c0_16] : memref<1x128xf32, #tpu.memory_space<vmem>>, vector<1x128xf32>
    %20 = vector.broadcast %19 : vector<1x128xf32> to vector<128x128xf32>
    %21 = arith.addf %18, %20 : vector<128x128xf32>
    %22 = vector.extract_strided_slice %21 {offsets = [0, 0], sizes = [128, 3], strides = [1, 1]} : vector<128x128xf32> to vector<128x3xf32>
    %c0_17 = arith.constant 0 : index
    %c0_18 = arith.constant 0 : index
    %23 = vector.load %arg23[%c0_17, %c0_18] : memref<128x3xf32, #tpu.memory_space<vmem>>, vector<128x3xf32>
    tpu.vector_store %arg23[%c0_17, %c0_18], %22 {strides = array<i32>} : memref<128x3xf32, #tpu.memory_space<vmem>>, vector<128x3xf32>,
    %24 = arith.truncf %15 : vector<128x128xf32> to vector<128x128xbf16>
    %25 = arith.truncf %21 : vector<128x128xf32> to vector<128x128xbf16>
    %c0_19 = arith.constant 0 : index
    %c0_20 = arith.constant 0 : index
    %26 = vector.load %arg8[%c0_19, %c0_20] : memref<128x128xbf16, #tpu.memory_space<vmem>>, vector<128x128xbf16>
    %cst_21 = arith.constant dense<0.000000e+00> : vector<128x128xf32>
    %27 = tpu.matmul %25, %26, %cst_21 {dimension_numbers = #tpu.dot_dimension_numbers<[1], [0], [0], [1], [0, 0, 1, 1], [], []>} : vector<128x128xbf16>, vector<128x128xbf16>, vector<128x128xf32> -> vector<128x128xf32>
    %c0_22 = arith.constant 0 : index
    %c0_23 = arith.constant 0 : index
    %28 = vector.load %arg9[%c0_22, %c0_23] : memref<128x128xbf16, #tpu.memory_space<vmem>>, vector<128x128xbf16>
    %cst_24 = arith.constant dense<0.000000e+00> : vector<128x128xf32>
    %29 = tpu.matmul %24, %28, %cst_24 {dimension_numbers = #tpu.dot_dimension_numbers<[1], [0], [0], [1], [0, 0, 1, 1], [], []>} : vector<128x128xbf16>, vector<128x128xbf16>, vector<128x128xf32> -> vector<128x128xf32>
    %30 = arith.addf %27, %29 : vector<128x128xf32>
    %c0_25 = arith.constant 0 : index
    %c0_26 = arith.constant 0 : index
    %31 = vector.load %arg10[%c0_25, %c0_26] : memref<1x128xf32, #tpu.memory_space<vmem>>, vector<1x128xf32>
    %32 = vector.broadcast %31 : vector<1x128xf32> to vector<128x128xf32>
    %33 = arith.addf %30, %32 : vector<128x128xf32>
    %cst_27 = arith.constant 0.000000e+00 : f32
    %34 = vector.broadcast %cst_27 : f32 to vector<128x128xf32>
    %35 = arith.maximumf %33, %34 : vector<128x128xf32>
    %36 = arith.truncf %35 : vector<128x128xf32> to vector<128x128xbf16>
    %c0_28 = arith.constant 0 : index
    %c0_29 = arith.constant 0 : index
    %37 = vector.load %arg11[%c0_28, %c0_29] : memref<128x128xbf16, #tpu.memory_space<vmem>>, vector<128x128xbf16>
    %cst_30 = arith.constant dense<0.000000e+00> : vector<128x128xf32>
    %38 = tpu.matmul %36, %37, %cst_30 {dimension_numbers = #tpu.dot_dimension_numbers<[1], [0], [0], [1], [0, 0, 1, 1], [], []>} : vector<128x128xbf16>, vector<128x128xbf16>, vector<128x128xf32> -> vector<128x128xf32>
    %c0_31 = arith.constant 0 : index
    %c0_32 = arith.constant 0 : index
    %39 = vector.load %arg12[%c0_31, %c0_32] : memref<1x128xf32, #tpu.memory_space<vmem>>, vector<1x128xf32>
    %40 = vector.broadcast %39 : vector<1x128xf32> to vector<128x128xf32>
    %41 = arith.addf %38, %40 : vector<128x128xf32>
    %cst_33 = arith.constant 0.000000e+00 : f32
    %42 = vector.broadcast %cst_33 : f32 to vector<128x128xf32>
    %43 = arith.maximumf %41, %42 : vector<128x128xf32>
    %44 = arith.truncf %43 : vector<128x128xf32> to vector<128x128xbf16>
    %c0_34 = arith.constant 0 : index
    %c0_35 = arith.constant 0 : index
    %45 = vector.load %arg13[%c0_34, %c0_35] : memref<128x128xbf16, #tpu.memory_space<vmem>>, vector<128x128xbf16>
    %cst_36 = arith.constant dense<0.000000e+00> : vector<128x128xf32>
    %46 = tpu.matmul %44, %45, %cst_36 {dimension_numbers = #tpu.dot_dimension_numbers<[1], [0], [0], [1], [0, 0, 1, 1], [], []>} : vector<128x128xbf16>, vector<128x128xbf16>, vector<128x128xf32> -> vector<128x128xf32>
    %c0_37 = arith.constant 0 : index
    %c0_38 = arith.constant 0 : index
    %47 = vector.load %arg14[%c0_37, %c0_38] : memref<1x128xf32, #tpu.memory_space<vmem>>, vector<1x128xf32>
    %48 = vector.broadcast %47 : vector<1x128xf32> to vector<128x128xf32>
    %49 = arith.addf %46, %48 : vector<128x128xf32>
    %50 = vector.extract_strided_slice %49 {offsets = [0, 0], sizes = [128, 3], strides = [1, 1]} : vector<128x128xf32> to vector<128x3xf32>
    %c0_39 = arith.constant 0 : index
    %c0_40 = arith.constant 0 : index
    %51 = vector.load %arg24[%c0_39, %c0_40] : memref<128x3xf32, #tpu.memory_space<vmem>>, vector<128x3xf32>
    tpu.vector_store %arg24[%c0_39, %c0_40], %50 {strides = array<i32>} : memref<128x3xf32, #tpu.memory_space<vmem>>, vector<128x3xf32>,
    %52 = arith.truncf %49 : vector<128x128xf32> to vector<128x128xbf16>
    %c0_41 = arith.constant 0 : index
    %c0_42 = arith.constant 0 : index
    %53 = vector.load %arg15[%c0_41, %c0_42] : memref<128x128xbf16, #tpu.memory_space<vmem>>, vector<128x128xbf16>
    %cst_43 = arith.constant dense<0.000000e+00> : vector<128x128xf32>
    %54 = tpu.matmul %52, %53, %cst_43 {dimension_numbers = #tpu.dot_dimension_numbers<[1], [0], [0], [1], [0, 0, 1, 1], [], []>} : vector<128x128xbf16>, vector<128x128xbf16>, vector<128x128xf32> -> vector<128x128xf32>
    %55 = arith.truncf %43 : vector<128x128xf32> to vector<128x128xbf16>
    %c0_44 = arith.constant 0 : index
    %c0_45 = arith.constant 0 : index
    %56 = vector.load %arg16[%c0_44, %c0_45] : memref<128x128xbf16, #tpu.memory_space<vmem>>, vector<128x128xbf16>
    %cst_46 = arith.constant dense<0.000000e+00> : vector<128x128xf32>
    %57 = tpu.matmul %55, %56, %cst_46 {dimension_numbers = #tpu.dot_dimension_numbers<[1], [0], [0], [1], [0, 0, 1, 1], [], []>} : vector<128x128xbf16>, vector<128x128xbf16>, vector<128x128xf32> -> vector<128x128xf32>
    %58 = arith.addf %54, %57 : vector<128x128xf32>
    %c0_47 = arith.constant 0 : index
    %c0_48 = arith.constant 0 : index
    %59 = vector.load %arg17[%c0_47, %c0_48] : memref<128x128xbf16, #tpu.memory_space<vmem>>, vector<128x128xbf16>
    %cst_49 = arith.constant dense<0.000000e+00> : vector<128x128xf32>
    %60 = tpu.matmul %24, %59, %cst_49 {dimension_numbers = #tpu.dot_dimension_numbers<[1], [0], [0], [1], [0, 0, 1, 1], [], []>} : vector<128x128xbf16>, vector<128x128xbf16>, vector<128x128xf32> -> vector<128x128xf32>
    %61 = arith.addf %58, %60 : vector<128x128xf32>
    %c0_50 = arith.constant 0 : index
    %c0_51 = arith.constant 0 : index
    %62 = vector.load %arg18[%c0_50, %c0_51] : memref<1x128xf32, #tpu.memory_space<vmem>>, vector<1x128xf32>
    %63 = vector.broadcast %62 : vector<1x128xf32> to vector<128x128xf32>
    %64 = arith.addf %61, %63 : vector<128x128xf32>
    %cst_52 = arith.constant 0.000000e+00 : f32
    %65 = vector.broadcast %cst_52 : f32 to vector<128x128xf32>
    %66 = arith.maximumf %64, %65 : vector<128x128xf32>
    %67 = arith.truncf %66 : vector<128x128xf32> to vector<128x128xbf16>
    %c0_53 = arith.constant 0 : index
    %c0_54 = arith.constant 0 : index
    %68 = vector.load %arg19[%c0_53, %c0_54] : memref<128x128xbf16, #tpu.memory_space<vmem>>, vector<128x128xbf16>
    %cst_55 = arith.constant dense<0.000000e+00> : vector<128x128xf32>
    %69 = tpu.matmul %67, %68, %cst_55 {dimension_numbers = #tpu.dot_dimension_numbers<[1], [0], [0], [1], [0, 0, 1, 1], [], []>} : vector<128x128xbf16>, vector<128x128xbf16>, vector<128x128xf32> -> vector<128x128xf32>
    %c0_56 = arith.constant 0 : index
    %c0_57 = arith.constant 0 : index
    %70 = vector.load %arg20[%c0_56, %c0_57] : memref<1x128xf32, #tpu.memory_space<vmem>>, vector<1x128xf32>
    %71 = vector.broadcast %70 : vector<1x128xf32> to vector<128x128xf32>
    %72 = arith.addf %69, %71 : vector<128x128xf32>
    %cst_58 = arith.constant 0.000000e+00 : f32
    %73 = vector.broadcast %cst_58 : f32 to vector<128x128xf32>
    %74 = arith.maximumf %72, %73 : vector<128x128xf32>
    %75 = arith.truncf %74 : vector<128x128xf32> to vector<128x128xbf16>
    %c0_59 = arith.constant 0 : index
    %c0_60 = arith.constant 0 : index
    %76 = vector.load %arg21[%c0_59, %c0_60] : memref<128x128xbf16, #tpu.memory_space<vmem>>, vector<128x128xbf16>
    %cst_61 = arith.constant dense<0.000000e+00> : vector<128x128xf32>
    %77 = tpu.matmul %75, %76, %cst_61 {dimension_numbers = #tpu.dot_dimension_numbers<[1], [0], [0], [1], [0, 0, 1, 1], [], []>} : vector<128x128xbf16>, vector<128x128xbf16>, vector<128x128xf32> -> vector<128x128xf32>
    %c0_62 = arith.constant 0 : index
    %c0_63 = arith.constant 0 : index
    %78 = vector.load %arg22[%c0_62, %c0_63] : memref<1x128xf32, #tpu.memory_space<vmem>>, vector<1x128xf32>
    %79 = vector.broadcast %78 : vector<1x128xf32> to vector<128x128xf32>
    %80 = arith.addf %77, %79 : vector<128x128xf32>
    %81 = vector.extract_strided_slice %80 {offsets = [0, 0], sizes = [128, 3], strides = [1, 1]} : vector<128x128xf32> to vector<128x3xf32>
    %c0_64 = arith.constant 0 : index
    %c0_65 = arith.constant 0 : index
    %82 = vector.load %arg25[%c0_64, %c0_65] : memref<128x3xf32, #tpu.memory_space<vmem>>, vector<128x3xf32>
    tpu.vector_store %arg25[%c0_64, %c0_65], %81 {strides = array<i32>} : memref<128x3xf32, #tpu.memory_space<vmem>>, vector<128x3xf32>,
    return
  }
  func.func @transform_0(%arg0: i32) -> (i32, i32) {
    %c0_i32 = arith.constant 0 : i32
    %c0_i32_0 = arith.constant 0 : i32
    return %arg0, %c0_i32 : i32, i32
  }
  func.func @transform_1(%arg0: i32) -> (i32, i32) {
    %c0_i32 = arith.constant 0 : i32
    %c0_i32_0 = arith.constant 0 : i32
    %c0_i32_1 = arith.constant 0 : i32
    return %c0_i32, %c0_i32_0 : i32, i32
  }
  func.func @transform_2(%arg0: i32) -> (i32, i32) {
    %c0_i32 = arith.constant 0 : i32
    %c0_i32_0 = arith.constant 0 : i32
    %c0_i32_1 = arith.constant 0 : i32
    return %c0_i32, %c0_i32_0 : i32, i32
  }
  func.func @transform_3(%arg0: i32) -> (i32, i32) {
    %c0_i32 = arith.constant 0 : i32
    %c0_i32_0 = arith.constant 0 : i32
    %c0_i32_1 = arith.constant 0 : i32
    return %c0_i32, %c0_i32_0 : i32, i32
  }
  func.func @transform_4(%arg0: i32) -> (i32, i32) {
    %c0_i32 = arith.constant 0 : i32
    %c0_i32_0 = arith.constant 0 : i32
    %c0_i32_1 = arith.constant 0 : i32
    return %c0_i32, %c0_i32_0 : i32, i32
  }
  func.func @transform_5(%arg0: i32) -> (i32, i32) {
    %c0_i32 = arith.constant 0 : i32
    %c0_i32_0 = arith.constant 0 : i32
    %c0_i32_1 = arith.constant 0 : i32
    return %c0_i32, %c0_i32_0 : i32, i32
  }
  func.func @transform_6(%arg0: i32) -> (i32, i32) {
    %c0_i32 = arith.constant 0 : i32
    %c0_i32_0 = arith.constant 0 : i32
    %c0_i32_1 = arith.constant 0 : i32
    return %c0_i32, %c0_i32_0 : i32, i32
  }
  func.func @transform_7(%arg0: i32) -> (i32, i32) {
    %c0_i32 = arith.constant 0 : i32
    %c0_i32_0 = arith.constant 0 : i32
    %c0_i32_1 = arith.constant 0 : i32
    return %c0_i32, %c0_i32_0 : i32, i32
  }
  func.func @transform_8(%arg0: i32) -> (i32, i32) {
    %c0_i32 = arith.constant 0 : i32
    %c0_i32_0 = arith.constant 0 : i32
    %c0_i32_1 = arith.constant 0 : i32
    return %c0_i32, %c0_i32_0 : i32, i32
  }
  func.func @transform_9(%arg0: i32) -> (i32, i32) {
    %c0_i32 = arith.constant 0 : i32
    %c0_i32_0 = arith.constant 0 : i32
    %c0_i32_1 = arith.constant 0 : i32
    return %c0_i32, %c0_i32_0 : i32, i32
  }
  func.func @transform_10(%arg0: i32) -> (i32, i32) {
    %c0_i32 = arith.constant 0 : i32
    %c0_i32_0 = arith.constant 0 : i32
    %c0_i32_1 = arith.constant 0 : i32
    return %c0_i32, %c0_i32_0 : i32, i32
  }
  func.func @transform_11(%arg0: i32) -> (i32, i32) {
    %c0_i32 = arith.constant 0 : i32
    %c0_i32_0 = arith.constant 0 : i32
    %c0_i32_1 = arith.constant 0 : i32
    return %c0_i32, %c0_i32_0 : i32, i32
  }
  func.func @transform_12(%arg0: i32) -> (i32, i32) {
    %c0_i32 = arith.constant 0 : i32
    %c0_i32_0 = arith.constant 0 : i32
    %c0_i32_1 = arith.constant 0 : i32
    return %c0_i32, %c0_i32_0 : i32, i32
  }
  func.func @transform_13(%arg0: i32) -> (i32, i32) {
    %c0_i32 = arith.constant 0 : i32
    %c0_i32_0 = arith.constant 0 : i32
    %c0_i32_1 = arith.constant 0 : i32
    return %c0_i32, %c0_i32_0 : i32, i32
  }
  func.func @transform_14(%arg0: i32) -> (i32, i32) {
    %c0_i32 = arith.constant 0 : i32
    %c0_i32_0 = arith.constant 0 : i32
    %c0_i32_1 = arith.constant 0 : i32
    return %c0_i32, %c0_i32_0 : i32, i32
  }
  func.func @transform_15(%arg0: i32) -> (i32, i32) {
    %c0_i32 = arith.constant 0 : i32
    %c0_i32_0 = arith.constant 0 : i32
    %c0_i32_1 = arith.constant 0 : i32
    return %c0_i32, %c0_i32_0 : i32, i32
  }
  func.func @transform_16(%arg0: i32) -> (i32, i32) {
    %c0_i32 = arith.constant 0 : i32
    %c0_i32_0 = arith.constant 0 : i32
    %c0_i32_1 = arith.constant 0 : i32
    return %c0_i32, %c0_i32_0 : i32, i32
  }
  func.func @transform_17(%arg0: i32) -> (i32, i32) {
    %c0_i32 = arith.constant 0 : i32
    %c0_i32_0 = arith.constant 0 : i32
    %c0_i32_1 = arith.constant 0 : i32
    return %c0_i32, %c0_i32_0 : i32, i32
  }
  func.func @transform_18(%arg0: i32) -> (i32, i32) {
    %c0_i32 = arith.constant 0 : i32
    %c0_i32_0 = arith.constant 0 : i32
    %c0_i32_1 = arith.constant 0 : i32
    return %c0_i32, %c0_i32_0 : i32, i32
  }
  func.func @transform_19(%arg0: i32) -> (i32, i32) {
    %c0_i32 = arith.constant 0 : i32
    %c0_i32_0 = arith.constant 0 : i32
    %c0_i32_1 = arith.constant 0 : i32
    return %c0_i32, %c0_i32_0 : i32, i32
  }
  func.func @transform_20(%arg0: i32) -> (i32, i32) {
    %c0_i32 = arith.constant 0 : i32
    %c0_i32_0 = arith.constant 0 : i32
    %c0_i32_1 = arith.constant 0 : i32
    return %c0_i32, %c0_i32_0 : i32, i32
  }
  func.func @transform_21(%arg0: i32) -> (i32, i32) {
    %c0_i32 = arith.constant 0 : i32
    %c0_i32_0 = arith.constant 0 : i32
    %c0_i32_1 = arith.constant 0 : i32
    return %c0_i32, %c0_i32_0 : i32, i32
  }
  func.func @transform_22(%arg0: i32) -> (i32, i32) {
    %c0_i32 = arith.constant 0 : i32
    %c0_i32_0 = arith.constant 0 : i32
    return %arg0, %c0_i32 : i32, i32
  }
  func.func @transform_23(%arg0: i32) -> (i32, i32) {
    %c0_i32 = arith.constant 0 : i32
    %c0_i32_0 = arith.constant 0 : i32
    return %arg0, %c0_i32 : i32, i32
  }
  func.func @transform_24(%arg0: i32) -> (i32, i32) {
    %c0_i32 = arith.constant 0 : i32
    %c0_i32_0 = arith.constant 0 : i32
    return %arg0, %c0_i32 : i32, i32
  }
}

</mosaic_0001>

<bundles_post_ra>
// kernel: tpu_custom_call.1
= control target key start
LH: loop header
LB: loop body
LE: loop exit
PB: predicated region body
PF: predicated region fallthrough
CT: control target
= control target key end

     0   :  { %s4209_s0 = inlined_call_operand.vmem [shape: bf16[128,32], index: 0, kind: input, shape index: {}]   ;;  %s4210_s1 = inlined_call_operand.vmem [shape: bf16[32,128], index: 1, kind: input, shape index: {}]   ;;  %s4211_s2 = inlined_call_operand.vmem [shape: f32[1,128], index: 2, kind: input, shape index: {}]   ;;  %s4212_s3 = inlined_call_operand.vmem [shape: bf16[128,128], index: 3, kind: input, shape index: {}]   ;;  %s4213_s4 = inlined_call_operand.vmem [shape: f32[1,128], index: 4, kind: input, shape index: {}]   ;;  %s4214_s5 = inlined_call_operand.hbm [shape: bf16[128,128], index: 5, kind: input, shape index: {}]   ;;  %s4215_s6 = inlined_call_operand.vmem [shape: f32[1,128], index: 6, kind: input, shape index: {}]   ;;  %s4216_s7 = inlined_call_operand.hbm [shape: bf16[128,128], index: 7, kind: input, shape index: {}]   ;;  %s4217_s8 = inlined_call_operand.hbm [shape: bf16[128,128], index: 8, kind: input, shape index: {}]   ;;  %s4218_s9 = inlined_call_operand.vmem [shape: f32[1,128], index: 9, kind: input, shape index: {}]   ;;  %s4219_s10 = inlined_call_operand.hbm [shape: bf16[128,128], index: 10, kind: input, shape index: {}]   ;;  %s4220_s11 = inlined_call_operand.vmem [shape: f32[1,128], index: 11, kind: input, shape index: {}]   ;;  %s4221_s12 = inlined_call_operand.hbm [shape: bf16[128,128], index: 12, kind: input, shape index: {}]   ;;  %s4222_s13 = inlined_call_operand.vmem [shape: f32[1,128], index: 13, kind: input, shape index: {}]   ;;  %s4223_s14 = inlined_call_operand.hbm [shape: bf16[128,128], index: 14, kind: input, shape index: {}]   ;;  %s4224_s15 = inlined_call_operand.hbm [shape: bf16[128,128], index: 15, kind: input, shape index: {}]   ;;  %s4225_s16 = inlined_call_operand.hbm [shape: bf16[128,128], index: 16, kind: input, shape index: {}]   ;;  %s4226_s17 = inlined_call_operand.vmem [shape: f32[1,128], index: 17, kind: input, shape index: {}]   ;;  %s4227_s18 = inlined_call_operand.hbm [shape: bf16[128,128], index: 18, kind: input, shape index: {}]   ;;  %s4228_s19 = inlined_call_operand.vmem [shape: f32[1,128], index: 19, kind: input, shape index: {}]   ;;  %s4229_s20 = inlined_call_operand.hbm [shape: bf16[128,128], index: 20, kind: input, shape index: {}]   ;;  %s4230_s21 = inlined_call_operand.vmem [shape: f32[1,128], index: 21, kind: input, shape index: {}]   ;;  %s4231_s22 = inlined_call_operand.vmem [shape: f32[128,3], index: 22, kind: output, shape index: {0}]   ;;  %s4232_s23 = inlined_call_operand.vmem [shape: f32[128,3], index: 23, kind: output, shape index: {1}]   ;;  %s4233_s24 = inlined_call_operand.vmem [shape: f32[128,3], index: 24, kind: output, shape index: {2}]  }
   0x1   :  { %4237 = sst [smem:[#allocation24_spill]] %s4209_s0 }
   0x2   :  { %4238 = sst [smem:[#allocation25_spill]] %s4210_s1 }
   0x3   :  { %4239 = sst [smem:[#allocation26_spill]] %s4211_s2 }
   0x4   :  { %4240 = sst [smem:[#allocation27_spill]] %s4212_s3 }
   0x5   :  { %4241 = sst [smem:[#allocation28_spill]] %s4213_s4 }
   0x6   :  { %4242 = sst [smem:[#allocation29_spill]] %s4214_s5 }
   0x7   :  { %4243 = sst [smem:[#allocation30_spill]] %s4215_s6 }
   0x8   :  { %4244 = sst [smem:[#allocation31_spill]] %s4216_s7 }
   0x9   :  { %4245 = sst [smem:[#allocation32_spill]] %s4217_s8 }
   0xa   :  { %30 = vsyncpa [#allocation3], 0 }
   0xb   :  { %31 = vsyncpa [#allocation5], 0 }
   0xc   :  { %32 = vsyncpa [#allocation8], 0 }
   0xd   :  { %33 = vsyncpa [#allocation11], 0 }
   0xe   :  { %34 = vsyncpa [#allocation14], 0 }
   0xf   :  { %35 = vsyncpa [#allocation17], 0  ;;  %s3525_s5 = smov [#allocation4]   ;;  %s3526_s27 = smov [#allocation7]  }
  0x10   :  { %s65_s26 = sshll.u32 %s3525_s5, 4  ;;  %s91_s28 = sshll.u32 %s3526_s27, 4  ;;  %s66_s26 = int_to_ptr.vmem [resolvable:$true] %s65_s26  ;;  %s92_s28 = int_to_ptr.vmem [resolvable:$true] %s91_s28 }
  0x11   :  { %s3321_s6 = scalar_lea.vmem %s66_s26, 1024  ;;  %p3326_p1 = scmp.lt.s32.totalorder %s66_s26, %s66_s26 }
  0x12   :  { %p3322_p0 = scmp.ne.s32.totalorder %s66_s26, %s3321_s6  ;;  %p3327_p2 = scmp.lt.s32.totalorder %s3321_s6, %s3321_s6 }
  0x14   :  { %p3328_p3 = por %p3327_p2, %p3326_p1 }
  0x16   :  { %p3329_p4 = pnand %p3328_p3, %p3322_p0 }
  0x18   :  { %3332 = shalt.err (!%p3329_p4)
}
  0x19   :  { %s3527_s2 = smov 64   ;;  %s3528_s29 = smov 4  }
  0x1a   :  { %s4246_s30 = sld [smem:[#allocation31_spill]]  ;;  %s3341_s3 = scalar_lea.vmem %s92_s28, 1024 }
  0x1b   :  { %p3342_p5 = scmp.ne.s32.totalorder %s92_s28, %s3341_s3  ;;  %p3346_p6 = scmp.lt.s32.totalorder %s92_s28, %s92_s28 }
  0x1c   :  { %p3347_p7 = scmp.lt.s32.totalorder %s3341_s3, %s3341_s3 }
  0x1e   :  { %p3348_p8 = por %p3347_p7, %p3346_p6 }
  0x20   :  { %71 = dma.hbm_to_vmem [thread:$0]  %s4246_s30, 1024, %s66_s26, [#allocation5], %s3527_s2, %s3527_s2, %s3528_s29  }
  0x21   :  { %p3349_p9 = pnand %p3348_p8, %p3342_p5 }
  0x23   :  { %3352 = shalt.err (!%p3349_p9)
}
  0x24   :  { %97 = dma.hbm_to_vmem [thread:$0]  %s4219_s10, 1024, %s92_s28, [#allocation8], %s3527_s2, %s3527_s2, %s3528_s29  }
  0x25   :  { %s3529_s4 = smov [#allocation10]   ;;  %s3530_s5 = smov [#allocation13]  }
  0x26   :  { %s119_s1 = sshll.u32 %s3529_s4, 4  ;;  %s143_s27 = sshll.u32 %s3530_s5, 4  ;;  %s120_s1 = int_to_ptr.vmem [resolvable:$true] %s119_s1  ;;  %s144_s27 = int_to_ptr.vmem [resolvable:$true] %s143_s27 }
  0x27   :  { %s3361_s26 = scalar_lea.vmem %s120_s1, 1024  ;;  %p3366_p11 = scmp.lt.s32.totalorder %s120_s1, %s120_s1 }
  0x28   :  { %p3362_p10 = scmp.ne.s32.totalorder %s120_s1, %s3361_s26  ;;  %p3367_p12 = scmp.lt.s32.totalorder %s3361_s26, %s3361_s26 }
  0x2a   :  { %p3368_p13 = por %p3367_p12, %p3366_p11 }
  0x2c   :  { %p3369_p0 = pnand %p3368_p13, %p3362_p10 }
  0x2e   :  { %3372 = shalt.err (!%p3369_p0)
}
  0x2f   :  { %125 = dma.hbm_to_vmem [thread:$0]  %s4223_s14, 1024, %s120_s1, [#allocation11], %s3527_s2, %s3527_s2, %s3528_s29  }
  0x30   :  { %s3381_s10 = scalar_lea.vmem %s144_s27, 1024  ;;  %p3386_p2 = scmp.lt.s32.totalorder %s144_s27, %s144_s27 }
  0x31   :  { %p3382_p1 = scmp.ne.s32.totalorder %s144_s27, %s3381_s10  ;;  %p3387_p3 = scmp.lt.s32.totalorder %s3381_s10, %s3381_s10 }
  0x33   :  { %p3388_p4 = por %p3387_p3, %p3386_p2 }
  0x35   :  { %p3389_p5 = pnand %p3388_p4, %p3382_p1 }
  0x37   :  { %3392 = shalt.err (!%p3389_p5)
}
  0x38   :  { %149 = dma.hbm_to_vmem [thread:$0]  %s4225_s16, 1024, %s144_s27, [#allocation14], %s3527_s2, %s3527_s2, %s3528_s29  }
  0x39   :  { %s3531_s30 = smov [#allocation2]   ;;  %s3532_s25 = smov [#allocation6]  }
  0x3a   :  { %s51_s3 = sshll.u32 %s3531_s30, 4  ;;  %s77_s8 = sshll.u32 %s3532_s25, 4  ;;  %s52_s3 = int_to_ptr.vmem [resolvable:$true] %s51_s3  ;;  %s78_s8 = int_to_ptr.vmem [resolvable:$true] %s77_s8 }
  0x3b   :  { %s3401_s14 = scalar_lea.vmem %s52_s3, 1024  ;;  %p3406_p7 = scmp.lt.s32.totalorder %s52_s3, %s52_s3 }
  0x3c   :  { %p3402_p6 = scmp.ne.s32.totalorder %s52_s3, %s3401_s14  ;;  %p3407_p8 = scmp.lt.s32.totalorder %s3401_s14, %s3401_s14 }
  0x3e   :  { %p3408_p9 = por %p3407_p8, %p3406_p7 }
  0x40   :  { %p3409_p10 = pnand %p3408_p9, %p3402_p6 }
  0x42   :  { %3412 = shalt.err (!%p3409_p10)
}
  0x43   :  { %s4247_s5 = sld [smem:[#allocation29_spill]]  ;;  %s3421_s16 = scalar_lea.vmem %s78_s8, 1024 }
  0x44   :  { %p3422_p11 = scmp.ne.s32.totalorder %s78_s8, %s3421_s16  ;;  %p3426_p12 = scmp.lt.s32.totalorder %s78_s8, %s78_s8 }
  0x45   :  { %p3427_p13 = scmp.lt.s32.totalorder %s3421_s16, %s3421_s16 }
  0x47   :  { %p3428_p0 = por %p3427_p13, %p3426_p12 }
  0x49   :  { %57 = dma.hbm_to_vmem [thread:$0]  %s4247_s5, 1024, %s52_s3, [#allocation3], %s3527_s2, %s3527_s2, %s3528_s29  }
  0x4a   :  { %p3429_p1 = pnand %p3428_p0, %p3422_p11 }
  0x4c   :  { %3432 = shalt.err (!%p3429_p1)
}
  0x4d   :  { %s4248_s6 = sld [smem:[#allocation32_spill]]  ;;  %s3533_s0 = smov [#allocation9]  }
  0x4e   :  { %s105_s10 = sshll.u32 %s3533_s0, 4  ;;  %s3534_s28 = smov [#allocation12]   ;;  %s106_s10 = int_to_ptr.vmem [resolvable:$true] %s105_s10 }
  0x4f   :  { %s131_s7 = sshll.u32 %s3534_s28, 4  ;;  %s3441_s30 = scalar_lea.vmem %s106_s10, 1024  ;;  %s132_s7 = int_to_ptr.vmem [resolvable:$true] %s131_s7 }
  0x50   :  { %p3442_p2 = scmp.ne.s32.totalorder %s106_s10, %s3441_s30  ;;  %p3446_p3 = scmp.lt.s32.totalorder %s106_s10, %s106_s10 }
  0x51   :  { %p3447_p4 = scmp.lt.s32.totalorder %s3441_s30, %s3441_s30 }
  0x53   :  { %83 = dma.hbm_to_vmem [thread:$0]  %s4248_s6, 1024, %s78_s8, [#allocation5], %s3527_s2, %s3527_s2, %s3528_s29  }
  0x54   :  { %p3448_p5 = por %p3447_p4, %p3446_p3 }
  0x56   :  { %p3449_p6 = pnand %p3448_p5, %p3442_p2 }
  0x58   :  { %3452 = shalt.err (!%p3449_p6)
}
  0x59   :  { %111 = dma.hbm_to_vmem [thread:$0]  %s4221_s12, 1024, %s106_s10, [#allocation8], %s3527_s2, %s3527_s2, %s3528_s29  }
  0x5a   :  { %s3461_s8 = scalar_lea.vmem %s132_s7, 1024  ;;  %p3466_p8 = scmp.lt.s32.totalorder %s132_s7, %s132_s7 }
  0x5b   :  { %p3462_p7 = scmp.ne.s32.totalorder %s132_s7, %s3461_s8  ;;  %p3467_p9 = scmp.lt.s32.totalorder %s3461_s8, %s3461_s8 }
  0x5d   :  { %p3468_p10 = por %p3467_p9, %p3466_p8 }
  0x5f   :  { %p3469_p11 = pnand %p3468_p10, %p3462_p7 }
  0x61   :  { %3472 = shalt.err (!%p3469_p11)
}
  0x62   :  { %137 = dma.hbm_to_vmem [thread:$0]  %s4224_s15, 1024, %s132_s7, [#allocation11], %s3527_s2, %s3527_s2, %s3528_s29  }
  0x63   :  { %s3535_s1 = smov [#allocation15]   ;;  %s3536_s16 = smov [#allocation16]  }
  0x64   :  { %s157_s5 = sshll.u32 %s3535_s1, 4  ;;  %s171_s27 = sshll.u32 %s3536_s16, 4  ;;  %s158_s5 = int_to_ptr.vmem [resolvable:$true] %s157_s5  ;;  %s172_s27 = int_to_ptr.vmem [resolvable:$true] %s171_s27 }
  0x65   :  { %s3481_s12 = scalar_lea.vmem %s158_s5, 1024  ;;  %p3486_p13 = scmp.lt.s32.totalorder %s158_s5, %s158_s5 }
  0x66   :  { %p3482_p12 = scmp.ne.s32.totalorder %s158_s5, %s3481_s12  ;;  %p3487_p0 = scmp.lt.s32.totalorder %s3481_s12, %s3481_s12 }
  0x68   :  { %p3488_p1 = por %p3487_p0, %p3486_p13 }
  0x6a   :  { %p3489_p2 = pnand %p3488_p1, %p3482_p12 }
  0x6c   :  { %3492 = shalt.err (!%p3489_p2)
}
  0x6d   :  { %163 = dma.hbm_to_vmem [thread:$0]  %s4227_s18, 1024, %s158_s5, [#allocation14], %s3527_s2, %s3527_s2, %s3528_s29  }
  0x6e   :  { %s3501_s15 = scalar_lea.vmem %s172_s27, 1024  ;;  %p3506_p4 = scmp.lt.s32.totalorder %s172_s27, %s172_s27 }
  0x6f   :  { %p3502_p3 = scmp.ne.s32.totalorder %s172_s27, %s3501_s15  ;;  %p3507_p5 = scmp.lt.s32.totalorder %s3501_s15, %s3501_s15 }
  0x71   :  { %p3508_p6 = por %p3507_p5, %p3506_p4 }
  0x73   :  { %p3509_p7 = pnand %p3508_p6, %p3502_p3 }
  0x75   :  { %3512 = shalt.err (!%p3509_p7)
}
  0x76   :  { %177 = dma.hbm_to_vmem [thread:$0]  %s4229_s20, 1024, %s172_s27, [#allocation17], %s3527_s2, %s3527_s2, %s3528_s29  }
  0x77   :  { %3513 = dma.done.wait [#allocation3], 1024  }
  0x78   :  { %3514 = vsyncadd [#allocation3], 4294966272 }
  0x79   :  { %3515 = dma.done.wait [#allocation5], 2048  }
  0x7a   :  { %3516 = vsyncadd [#allocation5], 4294965248 }
  0x7b   :  { %3517 = dma.done.wait [#allocation8], 2048  }
  0x7c   :  { %3518 = vsyncadd [#allocation8], 4294965248 }
  0x7d   :  { %3519 = dma.done.wait [#allocation11], 2048  }
  0x7e   :  { %3520 = vsyncadd [#allocation11], 4294965248 }
  0x7f   :  { %3521 = dma.done.wait [#allocation14], 2048  }
  0x80   :  { %3522 = vsyncadd [#allocation14], 4294965248 }
  0x81   :  { %3523 = dma.done.wait [#allocation17], 1024  }
  0x82   :  { %3524 = vsyncadd [#allocation17], 4294966272  ;;  %s4249_s7 = sld [smem:[#allocation25_spill]]  ;;  %vm290_vm0 = vcmask 261120   ;;  %v3233_v18 = vld [vmem:[#allocation2 + $0x38] sm:$0xff]   ;;  %v3235_v20 = vld [vmem:[#allocation2 + $0x30] sm:$0xff]  }
  0x83   :  { %s4250_s29 = sld [smem:[#allocation24_spill]]  ;;  %v3234_v19 = vld [vmem:[#allocation6 + $0x38] sm:$0xff]   ;;  %v3237_v21 = vld [vmem:[#allocation2 + $0x28] sm:$0xff]   ;;  %v3239_v22 = vld [vmem:[#allocation2 + $0x20] sm:$0xff]   ;;  %vm796_vm1 = vcmask 23552  }
  0x84   :  { %s4251_s16 = sld [smem:[#allocation27_spill]]  ;;  %v3241_v23 = vld [vmem:[#allocation2 + $0x18] sm:$0xff]   ;;  %v3236_v42 = vld [vmem:[#allocation6 + $0x30] sm:$0xff]   ;;  %v3238_v50 = vld [vmem:[#allocation6 + $0x28] sm:$0xff]  }
  0x85   :  { %s4252_s15 = sld [smem:[#allocation26_spill]]  ;;  %v3240_v58 = vld [vmem:[#allocation6 + $0x20] sm:$0xff]  }
  0x86   :  { %s4253_s18 = sld [smem:[#allocation28_spill]] }
  0x87   :  { %s4254_s30 = sld [smem:[#allocation30_spill]] }
  0x88   :  { %v3215_v0 = vld [vmem:[%s4249_s7 + $0x8] sm:$0xff]   ;;  %v3216_v1 = vld [vmem:[%s4249_s7] sm:$0xff]  }
  0x89   :  { %2815 = vmatprep.subr.bf16.mxu0 %v3215_v0  ;;  %v3217_v2 = vld [vmem:[%s4250_s29] sm:$0xff]   ;;  %v3218_v3 = vld [vmem:[%s4250_s29 + $0x8] sm:$0xff]   ;;  %v3219_v4 = vld [vmem:[%s4250_s29 + $0x10] sm:$0xff]  }
  0x8a   :  { %2816 = vmatpush3.bf16.msra.mxu0 %v3215_v0  ;;  %2819 = vmatprep.mubr.msk.bf16.mxu0 %vm290_vm0, %v3217_v2  ;;  %v3225_v5 = vld [vmem:[%s4251_s16 + $0x38] sm:$0xff]   ;;  %v3226_v6 = vld [vmem:[%s4251_s16 + $0x30] sm:$0xff]   ;;  %v3221_v8 = vld [vmem:[%s4250_s29 + $0x20] sm:$0xff]  }
  0x8b   :  { %2817 = vmatprep.subr.bf16.mxu0 %v3216_v1  ;;  %v3220_v7 = vld [vmem:[%s4250_s29 + $0x18] sm:$0xff]   ;;  %2835 = vmatprep.subr.bf16.mxu1 %v3225_v5  ;;  %v3227_v9 = vld [vmem:[%s4251_s16 + $0x28] sm:$0xff]   ;;  %v3228_v10 = vld [vmem:[%s4251_s16 + $0x20] sm:$0xff]  }
  0x8c   :  { %2836 = vmatpush3.bf16.msra.mxu1 %v3225_v5  ;;  %v3222_v11 = vld [vmem:[%s4250_s29 + $0x28] sm:$0xff]   ;;  %v3229_v12 = vld [vmem:[%s4251_s16 + $0x18] sm:$0xff]   ;;  %v3223_v13 = vld [vmem:[%s4250_s29 + $0x30] sm:$0xff]  }
  0x8d   :  { %2837 = vmatprep.subr.bf16.mxu1 %v3226_v6  ;;  %v3224_v14 = vld [vmem:[%s4250_s29 + $0x38] sm:$0xff]   ;;  %v3230_v15 = vld [vmem:[%s4251_s16 + $0x10] sm:$0xff]   ;;  %v3231_v16 = vld [vmem:[%s4251_s16 + $0x8] sm:$0xff]  }
  0x8e   :  { %2818 = vmatpush3.bf16.msra.mxu0 %v3216_v1  ;;  %v3232_v17 = vld [vmem:[%s4251_s16] sm:$0xff]   ;;  %v3242_v2 = vld [vmem:[#allocation6 + $0x18] sm:$0xff]  }
  0x8f   :  { %2867 = vmatprep.subr.bf16.mxu0 %v3233_v18  ;;  %v3787_v26 = vld [vmem:[%s4252_s15] ss:$0 sm:$0xff] }
  0x90   :  { %2838 = vmatpush3.bf16.msra.mxu1 %v3226_v6 }
  0x91   :  { %2820 = vmatmul.mubr.msk.bf16.vlgmr.msra.gmra.mxu0 %vm290_vm0, %v3218_v3  ;;  %2839 = vmatprep.subr.bf16.mxu1 %v3227_v9 }
  0x92   :  { %2823 = vmatprep.mubr.msk.bf16.mxu0 %vm290_vm0, %v3219_v4  ;;  %2868 = vmatpush3.bf16.msra.mxu0 %v3233_v18 }
  0x93   :  { %2869 = vmatprep.subr.bf16.mxu0 %v3235_v20 }
  0x94   :  { %2840 = vmatpush3.bf16.msra.mxu1 %v3227_v9 }
  0x95   :  { %2841 = vmatprep.subr.bf16.mxu1 %v3228_v10 }
  0x96   :  { %2870 = vmatpush3.bf16.msra.mxu0 %v3235_v20 }
  0x97   :  { %2871 = vmatprep.subr.bf16.mxu0 %v3237_v21 }
  0x98   :  { %2842 = vmatpush3.bf16.msra.mxu1 %v3228_v10 }
  0x99   :  { %2824 = vmatmul.mubr.msk.bf16.gmra.mxu0 %vm290_vm0, %v3220_v7  ;;  %2843 = vmatprep.subr.bf16.mxu1 %v3229_v12 }
  0x9a   :  { %2827 = vmatprep.mubr.msk.bf16.mxu0 %vm290_vm0, %v3221_v8  ;;  %2872 = vmatpush3.bf16.msra.mxu0 %v3237_v21  ;;  %v3243_v21 = vld [vmem:[#allocation2 + $0x10] sm:$0xff]  }
  0x9b   :  { %2873 = vmatprep.subr.bf16.mxu0 %v3239_v22 }
  0x9c   :  { %2844 = vmatpush3.bf16.msra.mxu1 %v3229_v12 }
  0x9d   :  { %2845 = vmatprep.subr.bf16.mxu1 %v3230_v15 }
  0x9e   :  { %2874 = vmatpush3.bf16.msra.mxu0 %v3239_v22  ;;  %v3244_v22 = vld [vmem:[#allocation6 + $0x10] sm:$0xff]  }
  0x9f   :  { %2875 = vmatprep.subr.bf16.mxu0 %v3241_v23 }
  0xa0   :  { %2846 = vmatpush3.bf16.msra.mxu1 %v3230_v15 }
  0xa1   :  { %2828 = vmatmul.mubr.msk.bf16.gmra.mxu0 %vm290_vm0, %v3222_v11  ;;  %2847 = vmatprep.subr.bf16.mxu1 %v3231_v16 }
  0xa2   :  { %2831 = vmatprep.mubr.msk.bf16.mxu0 %vm290_vm0, %v3223_v13  ;;  %2876 = vmatpush3.bf16.msra.mxu0 %v3241_v23  ;;  %v3245_v23 = vld [vmem:[#allocation2 + $0x8] sm:$0xff]  }
  0xa3   :  { %2877 = vmatprep.subr.bf16.mxu0 %v3243_v21 }
  0xa4   :  { %2848 = vmatpush3.bf16.msra.mxu1 %v3231_v16 }
  0xa5   :  { %2849 = vmatprep.subr.bf16.mxu1 %v3232_v17 }
  0xa6   :  { %2878 = vmatpush3.bf16.msra.mxu0 %v3243_v21 }
  0xa7   :  { %2879 = vmatprep.subr.bf16.mxu0 %v3245_v23 }
  0xa8   :  { %2850 = vmatpush3.bf16.msra.mxu1 %v3232_v17 }
  0xa9   :  { %2832 = vmatmul.mubr.msk.bf16.gmra.mxu0 %vm290_vm0, %v3224_v14  ;;  %2899 = vmatprep.subr.bf16.mxu1 %v3234_v19 }
  0xaa   :  { %2880 = vmatpush3.bf16.msra.mxu0 %v3245_v23 }
 0x151   :  { %v2821_v24 = vpop.f32.mrf.mxu0 }
 0x152   :  { %v358_v30 = vadd.f32 %v2821_v24, %v3787_v26  ;;  %v3246_v24 = vld [vmem:[#allocation6 + $0x8] sm:$0xff]  }
 0x153   :  { %v349_v25 = vpop.f32.mrf.mxu0 }
 0x154   :  { %v350_v28 = vadd.f32 %v3787_v26, %v349_v25  ;;  %v414_v37 = vmax.f32 %v358_v30, 0.0  ;;  %v3247_v25 = vld [vmem:[#allocation2] sm:$0xff]  }
 0x155   :  { %v2822_v27 = vpop.f32.mrf.mxu0  ;;  %2881 = vmatprep.subr.bf16.mxu0 %v3247_v25  ;;  %v3808_v30 = vld [vmem:[%s4253_s18] ss:$0 sm:$0xff] }
 0x156   :  { %v361_v29 = vadd.f32 %v2822_v27, %v3787_v26  ;;  %v412_v35 = vmax.f32 %v350_v28, 0.0  ;;  %2882 = vmatpush3.bf16.msra.mxu0 %v3247_v25  ;;  %v3249_v27 = vld [vmem:[#allocation4 + $0x38] sm:$0xff]  }
 0x157   :  { %v352_v31 = vpop.f32.mrf.mxu0  ;;  %2931 = vmatprep.subr.bf16.mxu0 %v3249_v27 }
 0x158   :  { %v353_v32 = vadd.f32 %v3787_v26, %v352_v31  ;;  %v415_v33 = vmax.f32 %v361_v29, 0.0 }
 0x159   :  { %v2825_v34 = vpop.f32.mrf.mxu0 }
 0x15a   :  { %v413_v36 = vmax.f32 %v353_v32, 0.0  ;;  %v429_v40 = vpack.c.bf16 %v415_v33, %v414_v37  ;;  %v374_v45 = vadd.f32 %v2825_v34, %v3787_v26 }
 0x15b   :  { %v365_v38 = vpop.f32.mrf.mxu0 }
 0x15c   :  { %v428_v39 = vpack.c.bf16 %v413_v36, %v412_v35  ;;  %v366_v43 = vadd.f32 %v3787_v26, %v365_v38  ;;  %v418_v53 = vmax.f32 %v374_v45, 0.0 }
 0x15d   :  { %v2826_v41 = vpop.f32.mrf.mxu0 }
 0x15e   :  { %v377_v44 = vadd.f32 %v2826_v41, %v3787_v26  ;;  %2851 = vmatprep.mubr.bf16.mxu1 %v428_v39  ;;  %v416_v51 = vmax.f32 %v366_v43, 0.0 }
 0x15f   :  { %v368_v46 = vpop.f32.mrf.mxu0  ;;  %2852 = vmatmul.mubr.bf16.vlgmr.msra.gmra.mxu1 %v429_v40 }
 0x160   :  { %v369_v47 = vadd.f32 %v3787_v26, %v368_v46  ;;  %2900 = vmatpush3.bf16.msra.mxu1 %v3234_v19  ;;  %v419_v48 = vmax.f32 %v377_v44, 0.0  ;;  %v3250_v46 = vld [vmem:[#allocation4 + $0x30] sm:$0xff]  }
 0x161   :  { %v2829_v49 = vpop.f32.mrf.mxu0  ;;  %2901 = vmatprep.subr.bf16.mxu1 %v3236_v42 }
 0x162   :  { %v417_v52 = vmax.f32 %v369_v47, 0.0  ;;  %v431_v56 = vpack.c.bf16 %v419_v48, %v418_v53  ;;  %v390_v61 = vadd.f32 %v2829_v49, %v3787_v26 }
 0x163   :  { %v381_v54 = vpop.f32.mrf.mxu0 }
 0x164   :  { %v430_v55 = vpack.c.bf16 %v417_v52, %v416_v51  ;;  %2902 = vmatpush3.bf16.msra.mxu1 %v3236_v42  ;;  %v382_v59 = vadd.f32 %v3787_v26, %v381_v54  ;;  %v422_v5 = vmax.f32 %v390_v61, 0.0  ;;  %v3251_v54 = vld [vmem:[#allocation4 + $0x28] sm:$0xff]  }
 0x165   :  { %v2830_v57 = vpop.f32.mrf.mxu0  ;;  %2903 = vmatprep.subr.bf16.mxu1 %v3238_v50 }
 0x166   :  { %v393_v60 = vadd.f32 %v2830_v57, %v3787_v26  ;;  %2855 = vmatprep.mubr.bf16.mxu1 %v430_v55  ;;  %v420_v3 = vmax.f32 %v382_v59, 0.0 }
 0x167   :  { %v384_v62 = vpop.f32.mrf.mxu0  ;;  %2856 = vmatmul.mubr.bf16.gmra.mxu1 %v431_v56 }
 0x168   :  { %v385_v63 = vadd.f32 %v3787_v26, %v384_v62  ;;  %2904 = vmatpush3.bf16.msra.mxu1 %v3238_v50  ;;  %v423_v0 = vmax.f32 %v393_v60, 0.0  ;;  %v3252_v62 = vld [vmem:[#allocation4 + $0x20] sm:$0xff]  }
 0x169   :  { %v2833_v1 = vpop.f32.mrf.mxu0  ;;  %2905 = vmatprep.subr.bf16.mxu1 %v3240_v58 }
 0x16a   :  { %v421_v4 = vmax.f32 %v385_v63, 0.0  ;;  %v433_v8 = vpack.c.bf16 %v423_v0, %v422_v5  ;;  %v406_v12 = vadd.f32 %v2833_v1, %v3787_v26 }
 0x16b   :  { %v397_v6 = vpop.f32.mrf.mxu0 }
 0x16c   :  { %v432_v7 = vpack.c.bf16 %v421_v4, %v420_v3  ;;  %2906 = vmatpush3.bf16.msra.mxu1 %v3240_v58  ;;  %v398_v10 = vadd.f32 %v3787_v26, %v397_v6  ;;  %v426_v18 = vmax.f32 %v406_v12, 0.0  ;;  %v3253_v6 = vld [vmem:[#allocation4 + $0x18] sm:$0xff]  }
 0x16d   :  { %v2834_v9 = vpop.f32.mrf.mxu0  ;;  %2907 = vmatprep.subr.bf16.mxu1 %v3242_v2 }
 0x16e   :  { %v409_v11 = vadd.f32 %v2834_v9, %v3787_v26  ;;  %2859 = vmatprep.mubr.bf16.mxu1 %v432_v7  ;;  %v424_v16 = vmax.f32 %v398_v10, 0.0 }
 0x16f   :  { %v400_v13 = vpop.f32.mrf.mxu0  ;;  %2860 = vmatmul.mubr.bf16.gmra.mxu1 %v433_v8 }
 0x170   :  { %v401_v14 = vadd.f32 %v3787_v26, %v400_v13  ;;  %2908 = vmatpush3.bf16.msra.mxu1 %v3242_v2  ;;  %v427_v15 = vmax.f32 %v409_v11, 0.0  ;;  %v3248_v26 = vld [vmem:[#allocation6] sm:$0xff]  }
 0x171   :  { %2909 = vmatprep.subr.bf16.mxu1 %v3244_v22 }
 0x172   :  { %v425_v17 = vmax.f32 %v401_v14, 0.0  ;;  %v435_v20 = vpack.c.bf16 %v427_v15, %v426_v18  ;;  %v3254_v14 = vld [vmem:[#allocation4 + $0x10] sm:$0xff]  }
 0x174   :  { %v434_v19 = vpack.c.bf16 %v425_v17, %v424_v16  ;;  %2910 = vmatpush3.bf16.msra.mxu1 %v3244_v22 }
 0x175   :  { %2911 = vmatprep.subr.bf16.mxu1 %v3246_v24 }
 0x176   :  { %2863 = vmatprep.mubr.bf16.mxu1 %v434_v19 }
 0x177   :  { %2864 = vmatmul.mubr.bf16.gmra.mxu1 %v435_v20 }
 0x178   :  { %2912 = vmatpush3.bf16.msra.mxu1 %v3246_v24 }
 0x179   :  { %2913 = vmatprep.subr.bf16.mxu1 %v3248_v26 }
 0x17c   :  { %2914 = vmatpush3.bf16.msra.mxu1 %v3248_v26  ;;  %v3255_v26 = vld [vmem:[#allocation4 + $0x8] sm:$0xff]  }
 0x21f   :  { %v2853_v28 = vpop.f32.mrf.mxu1 }
 0x220   :  { %v550_v34 = vadd.f32 %v2853_v28, %v3808_v30  ;;  %v3257_v28 = vld [vmem:[#allocation7 + $0x38] sm:$0xff]  }
 0x221   :  { %v541_v29 = vpop.f32.mrf.mxu1  ;;  %2963 = vmatprep.subr.bf16.mxu1 %v3257_v28 }
 0x222   :  { %v542_v32 = vadd.f32 %v3808_v30, %v541_v29  ;;  %v606_v41 = vmax.f32 %v550_v34, 0.0  ;;  %v3258_v29 = vld [vmem:[#allocation7 + $0x30] sm:$0xff]  }
 0x223   :  { %v2854_v31 = vpop.f32.mrf.mxu1 }
 0x224   :  { %v553_v33 = vadd.f32 %v2854_v31, %v3808_v30  ;;  %v604_v39 = vmax.f32 %v542_v32, 0.0  ;;  %v3260_v31 = vld [vmem:[#allocation7 + $0x20] sm:$0xff]   ;;  %v3261_v32 = vld [vmem:[#allocation7 + $0x18] sm:$0xff]  }
 0x225   :  { %v544_v35 = vpop.f32.mrf.mxu1 }
 0x226   :  { %v545_v36 = vadd.f32 %v3808_v30, %v544_v35  ;;  %v607_v37 = vmax.f32 %v553_v33, 0.0  ;;  %v2542_v33 = vld [vmem:[%s4254_s30] ss:$0 sm:$0xff] }
 0x227   :  { %v2857_v38 = vpop.f32.mrf.mxu1 }
 0x228   :  { %v605_v40 = vmax.f32 %v545_v36, 0.0  ;;  %v3816_v44 = vpack.c.bf16 %v607_v37, %v606_v41  ;;  %v566_v49 = vadd.f32 %v2857_v38, %v3808_v30 }
 0x229   :  { %v557_v42 = vpop.f32.mrf.mxu1 }
 0x22a   :  { %v3814_v43 = vpack.c.bf16 %v605_v40, %v604_v39  ;;  %v558_v47 = vadd.f32 %v3808_v30, %v557_v42  ;;  %v610_v57 = vmax.f32 %v566_v49, 0.0 }
 0x22b   :  { %v2858_v45 = vpop.f32.mrf.mxu1 }
 0x22c   :  { %v569_v48 = vadd.f32 %v2858_v45, %v3808_v30  ;;  %2883 = vmatprep.mubr.bf16.mxu0 %v3814_v43  ;;  %2915 = vmatprep.mubr.bf16.mxu1 %v3814_v43  ;;  %v608_v55 = vmax.f32 %v558_v47, 0.0 }
 0x22d   :  { %v560_v50 = vpop.f32.mrf.mxu1  ;;  %2884 = vmatmul.mubr.bf16.vlgmr.msra.gmra.mxu0 %v3816_v44  ;;  %2916 = vmatmul.mubr.bf16.vlgmr.msra.gmra.mxu1 %v3816_v44 }
 0x22e   :  { %v561_v51 = vadd.f32 %v3808_v30, %v560_v50  ;;  %2932 = vmatpush3.bf16.msra.mxu0 %v3249_v27  ;;  %v611_v52 = vmax.f32 %v569_v48, 0.0  ;;  %v3256_v27 = vld [vmem:[#allocation4] sm:$0xff]   ;;  %2964 = vmatpush3.bf16.msra.mxu1 %v3257_v28 }
 0x22f   :  { %v2861_v53 = vpop.f32.mrf.mxu1  ;;  %2933 = vmatprep.subr.bf16.mxu0 %v3250_v46  ;;  %2965 = vmatprep.subr.bf16.mxu1 %v3258_v29 }
 0x230   :  { %v609_v56 = vmax.f32 %v561_v51, 0.0  ;;  %v3828_v60 = vpack.c.bf16 %v611_v52, %v610_v57  ;;  %v582_v1 = vadd.f32 %v2861_v53, %v3808_v30 }
 0x231   :  { %v573_v58 = vpop.f32.mrf.mxu1 }
 0x232   :  { %v3826_v59 = vpack.c.bf16 %v609_v56, %v608_v55  ;;  %2934 = vmatpush3.bf16.msra.mxu0 %v3250_v46  ;;  %v574_v63 = vadd.f32 %v3808_v30, %v573_v58  ;;  %v614_v9 = vmax.f32 %v582_v1, 0.0  ;;  %2966 = vmatpush3.bf16.msra.mxu1 %v3258_v29 }
 0x233   :  { %v2862_v61 = vpop.f32.mrf.mxu1  ;;  %2935 = vmatprep.subr.bf16.mxu0 %v3251_v54 }
 0x234   :  { %v585_v0 = vadd.f32 %v2862_v61, %v3808_v30  ;;  %2887 = vmatprep.mubr.bf16.mxu0 %v3826_v59  ;;  %2919 = vmatprep.mubr.bf16.mxu1 %v3826_v59  ;;  %v612_v7 = vmax.f32 %v574_v63, 0.0 }
 0x235   :  { %v576_v2 = vpop.f32.mrf.mxu1  ;;  %2888 = vmatmul.mubr.bf16.gmra.mxu0 %v3828_v60  ;;  %2920 = vmatmul.mubr.bf16.gmra.mxu1 %v3828_v60 }
 0x236   :  { %v577_v3 = vadd.f32 %v3808_v30, %v576_v2  ;;  %2936 = vmatpush3.bf16.msra.mxu0 %v3251_v54  ;;  %v615_v4 = vmax.f32 %v585_v0, 0.0 }
 0x237   :  { %v2865_v5 = vpop.f32.mrf.mxu1  ;;  %2937 = vmatprep.subr.bf16.mxu0 %v3252_v62 }
 0x238   :  { %v613_v8 = vmax.f32 %v577_v3, 0.0  ;;  %v3840_v12 = vpack.c.bf16 %v615_v4, %v614_v9  ;;  %v598_v17 = vadd.f32 %v2865_v5, %v3808_v30 }
 0x239   :  { %v589_v10 = vpop.f32.mrf.mxu1 }
 0x23a   :  { %v3838_v11 = vpack.c.bf16 %v613_v8, %v612_v7  ;;  %2938 = vmatpush3.bf16.msra.mxu0 %v3252_v62  ;;  %v590_v15 = vadd.f32 %v3808_v30, %v589_v10  ;;  %v618_v23 = vmax.f32 %v598_v17, 0.0  ;;  %v3263_v17 = vld [vmem:[#allocation7 + $0x8] sm:$0xff]  }
 0x23b   :  { %v2866_v13 = vpop.f32.mrf.mxu1  ;;  %2939 = vmatprep.subr.bf16.mxu0 %v3253_v6 }
 0x23c   :  { %v601_v16 = vadd.f32 %v2866_v13, %v3808_v30  ;;  %2891 = vmatprep.mubr.bf16.mxu0 %v3838_v11  ;;  %2923 = vmatprep.mubr.bf16.mxu1 %v3838_v11  ;;  %v616_v21 = vmax.f32 %v590_v15, 0.0 }
 0x23d   :  { %v592_v18 = vpop.f32.mrf.mxu1  ;;  %2892 = vmatmul.mubr.bf16.gmra.mxu0 %v3840_v12  ;;  %2924 = vmatmul.mubr.bf16.gmra.mxu1 %v3840_v12 }
 0x23e   :  { %v593_v19 = vadd.f32 %v3808_v30, %v592_v18  ;;  %2940 = vmatpush3.bf16.msra.mxu0 %v3253_v6  ;;  %v619_v20 = vmax.f32 %v601_v16, 0.0  ;;  %v3259_v30 = vld [vmem:[#allocation7 + $0x28] sm:$0xff]   ;;  %v3262_v16 = vld [vmem:[#allocation7 + $0x10] sm:$0xff]   ;;  %v3264_v18 = vld [vmem:[#allocation7] sm:$0xff]  }
 0x23f   :  { %2941 = vmatprep.subr.bf16.mxu0 %v3254_v14  ;;  %2967 = vmatprep.subr.bf16.mxu1 %v3259_v30 }
 0x240   :  { %v617_v22 = vmax.f32 %v593_v19, 0.0  ;;  %v3852_v25 = vpack.c.bf16 %v619_v20, %v618_v23  ;;  %2968 = vmatpush3.bf16.msra.mxu1 %v3259_v30  ;;  %v3265_v19 = vld [vmem:[#allocation9 + $0x38] sm:$0xff]   ;;  %v3271_v23 = vld [vmem:[#allocation9 + $0x20] sm:$0xff]  }
 0x241   :  { %2969 = vmatprep.subr.bf16.mxu1 %v3260_v31  ;;  %v3925_v20 = vld [vmem:[#allocation12 + $0x38] sm:$0xff]  }
 0x242   :  { %v3850_v24 = vpack.c.bf16 %v617_v22, %v616_v21  ;;  %2942 = vmatpush3.bf16.msra.mxu0 %v3254_v14  ;;  %v3267_v21 = vld [vmem:[#allocation9 + $0x30] sm:$0xff]   ;;  %v3269_v22 = vld [vmem:[#allocation9 + $0x28] sm:$0xff]  }
 0x243   :  { %2943 = vmatprep.subr.bf16.mxu0 %v3255_v26 }
 0x244   :  { %2895 = vmatprep.mubr.bf16.mxu0 %v3850_v24  ;;  %2927 = vmatprep.mubr.bf16.mxu1 %v3850_v24 }
 0x245   :  { %2896 = vmatmul.mubr.bf16.gmra.mxu0 %v3852_v25  ;;  %2928 = vmatmul.mubr.bf16.gmra.mxu1 %v3852_v25 }
 0x246   :  { %2944 = vmatpush3.bf16.msra.mxu0 %v3255_v26  ;;  %2970 = vmatpush3.bf16.msra.mxu1 %v3260_v31  ;;  %v3273_v26 = vld [vmem:[#allocation9 + $0x18] sm:$0xff]  }
 0x247   :  { %2945 = vmatprep.subr.bf16.mxu0 %v3256_v27  ;;  %2971 = vmatprep.subr.bf16.mxu1 %v3261_v32 }
 0x24a   :  { %2946 = vmatpush3.bf16.msra.mxu0 %v3256_v27  ;;  %2972 = vmatpush3.bf16.msra.mxu1 %v3261_v32 }
 0x24b   :  { %2973 = vmatprep.subr.bf16.mxu1 %v3262_v16  ;;  %2995 = vmatprep.subr.bf16.mxu0 %v3265_v19 }
 0x24e   :  { %2974 = vmatpush3.bf16.msra.mxu1 %v3262_v16 }
 0x24f   :  { %2975 = vmatprep.subr.bf16.mxu1 %v3263_v17 }
 0x252   :  { %2976 = vmatpush3.bf16.msra.mxu1 %v3263_v17  ;;  %v3270_v17 = vld [vmem:[#allocation12 + $0x28] sm:$0xff]  }
 0x253   :  { %2977 = vmatprep.subr.bf16.mxu1 %v3264_v18 }
 0x256   :  { %2978 = vmatpush3.bf16.msra.mxu1 %v3264_v18 }
 0x257   :  { %3027 = vmatprep.subr.bf16.mxu1 %v3925_v20 }
 0x2ed   :  { %v2885_v34 = vpop.f32.mrf.mxu0  ;;  %v2917_v27 = vpop.f32.mrf.mxu1 }
 0x2ee   :  { %v742_v35 = vadd.f32 %v2885_v34, %v2542_v33 }
 0x2ef   :  { %v733_v36 = vpop.f32.mrf.mxu0  ;;  %v935_v28 = vpop.f32.mrf.mxu1 }
 0x2f0   :  { %799 = vst.msk [vmem:[%s4231_s22 + $0x10] sm:$0xff] %vm796_vm1, %v742_v35  ;;  %v734_v37 = vadd.f32 %v2542_v33, %v733_v36 }
 0x2f1   :  { %v2886_v38 = vpop.f32.mrf.mxu0  ;;  %v2918_v29 = vpop.f32.mrf.mxu1 }
 0x2f2   :  { %797 = vst.msk [vmem:[%s4231_s22] sm:$0xff] %vm796_vm1, %v734_v37  ;;  %v745_v39 = vadd.f32 %v2886_v38, %v2542_v33 }
 0x2f3   :  { %v736_v40 = vpop.f32.mrf.mxu0  ;;  %v938_v30 = vpop.f32.mrf.mxu1 }
 0x2f4   :  { %800 = vst.msk [vmem:[%s4231_s22 + $0x18] sm:$0xff] %vm796_vm1, %v745_v39  ;;  %v737_v41 = vadd.f32 %v2542_v33, %v736_v40  ;;  %v814_v47 = vpack.c.bf16 %v745_v39, %v742_v35 }
 0x2f5   :  { %v2889_v42 = vpop.f32.mrf.mxu0  ;;  %v2921_v31 = vpop.f32.mrf.mxu1 }
 0x2f6   :  { %798 = vst.msk [vmem:[%s4231_s22 + $0x8] sm:$0xff] %vm796_vm1, %v737_v41  ;;  %v813_v45 = vpack.c.bf16 %v737_v41, %v734_v37  ;;  %v758_v46 = vadd.f32 %v2889_v42, %v2542_v33  ;;  %v3931_v41 = vld [vmem:[%s4218_s9] ss:$0 sm:$0xff] }
 0x2f7   :  { %v749_v48 = vpop.f32.mrf.mxu0  ;;  %v951_v32 = vpop.f32.mrf.mxu1 }
 0x2f8   :  { %803 = vst.msk [vmem:[%s4231_s22 + $0x30] sm:$0xff] %vm796_vm1, %v758_v46  ;;  %v750_v49 = vadd.f32 %v2542_v33, %v749_v48  ;;  %2947 = vmatprep.mubr.bf16.mxu0 %v813_v45 }
 0x2f9   :  { %v2890_v50 = vpop.f32.mrf.mxu0  ;;  %2948 = vmatmul.mubr.bf16.vlgmr.msra.gmra.mxu0 %v814_v47 }
 0x2fa   :  { %801 = vst.msk [vmem:[%s4231_s22 + $0x20] sm:$0xff] %vm796_vm1, %v750_v49  ;;  %v761_v51 = vadd.f32 %v2890_v50, %v2542_v33  ;;  %2996 = vmatpush3.bf16.msra.mxu0 %v3265_v19 }
 0x2fb   :  { %v752_v52 = vpop.f32.mrf.mxu0  ;;  %2997 = vmatprep.subr.bf16.mxu0 %v3267_v21 }
 0x2fc   :  { %804 = vst.msk [vmem:[%s4231_s22 + $0x38] sm:$0xff] %vm796_vm1, %v761_v51  ;;  %v753_v53 = vadd.f32 %v2542_v33, %v752_v52  ;;  %v816_v57 = vpack.c.bf16 %v761_v51, %v758_v46 }
 0x2fd   :  { %v2893_v54 = vpop.f32.mrf.mxu0 }
 0x2fe   :  { %802 = vst.msk [vmem:[%s4231_s22 + $0x28] sm:$0xff] %vm796_vm1, %v753_v53  ;;  %v815_v55 = vpack.c.bf16 %v753_v53, %v750_v49  ;;  %v774_v56 = vadd.f32 %v2893_v54, %v2542_v33  ;;  %2998 = vmatpush3.bf16.msra.mxu0 %v3267_v21 }
 0x2ff   :  { %v765_v58 = vpop.f32.mrf.mxu0  ;;  %2999 = vmatprep.subr.bf16.mxu0 %v3269_v22 }
 0x300   :  { %807 = vst.msk [vmem:[%s4231_s22 + $0x50] sm:$0xff] %vm796_vm1, %v774_v56  ;;  %v766_v61 = vadd.f32 %v2542_v33, %v765_v58  ;;  %2951 = vmatprep.mubr.bf16.mxu0 %v815_v55 }
 0x301   :  { %v2894_v62 = vpop.f32.mrf.mxu0  ;;  %2952 = vmatmul.mubr.bf16.gmra.mxu0 %v816_v57 }
 0x302   :  { %805 = vst.msk [vmem:[%s4231_s22 + $0x40] sm:$0xff] %vm796_vm1, %v766_v61  ;;  %v777_v63 = vadd.f32 %v2894_v62, %v2542_v33  ;;  %3000 = vmatpush3.bf16.msra.mxu0 %v3269_v22 }
 0x303   :  { %v768_v0 = vpop.f32.mrf.mxu0  ;;  %3001 = vmatprep.subr.bf16.mxu0 %v3271_v23 }
 0x304   :  { %808 = vst.msk [vmem:[%s4231_s22 + $0x58] sm:$0xff] %vm796_vm1, %v777_v63  ;;  %v769_v1 = vadd.f32 %v2542_v33, %v768_v0  ;;  %v818_v5 = vpack.c.bf16 %v777_v63, %v774_v56 }
 0x305   :  { %v2897_v2 = vpop.f32.mrf.mxu0 }
 0x306   :  { %806 = vst.msk [vmem:[%s4231_s22 + $0x48] sm:$0xff] %vm796_vm1, %v769_v1  ;;  %v817_v3 = vpack.c.bf16 %v769_v1, %v766_v61  ;;  %v790_v4 = vadd.f32 %v2897_v2, %v2542_v33  ;;  %3002 = vmatpush3.bf16.msra.mxu0 %v3271_v23 }
 0x307   :  { %v781_v6 = vpop.f32.mrf.mxu0  ;;  %3003 = vmatprep.subr.bf16.mxu0 %v3273_v26 }
 0x308   :  { %811 = vst.msk [vmem:[%s4231_s22 + $0x70] sm:$0xff] %vm796_vm1, %v790_v4  ;;  %v782_v7 = vadd.f32 %v2542_v33, %v781_v6  ;;  %2955 = vmatprep.mubr.bf16.mxu0 %v817_v3 }
 0x309   :  { %v2898_v8 = vpop.f32.mrf.mxu0  ;;  %2956 = vmatmul.mubr.bf16.gmra.mxu0 %v818_v5  ;;  %v3268_v5 = vld [vmem:[#allocation12 + $0x30] sm:$0xff]  }
 0x30a   :  { %809 = vst.msk [vmem:[%s4231_s22 + $0x60] sm:$0xff] %vm796_vm1, %v782_v7  ;;  %v793_v9 = vadd.f32 %v2898_v8, %v2542_v33  ;;  %3004 = vmatpush3.bf16.msra.mxu0 %v3273_v26 }
 0x30b   :  { %v784_v10 = vpop.f32.mrf.mxu0 }
 0x30c   :  { %812 = vst.msk [vmem:[%s4231_s22 + $0x78] sm:$0xff] %vm796_vm1, %v793_v9  ;;  %v785_v13 = vadd.f32 %v2542_v33, %v784_v10  ;;  %v820_v15 = vpack.c.bf16 %v793_v9, %v790_v4  ;;  %v2922_v33 = vpop.f32.mrf.mxu1 }
 0x30e   :  { %810 = vst.msk [vmem:[%s4231_s22 + $0x68] sm:$0xff] %vm796_vm1, %v785_v13  ;;  %v819_v14 = vpack.c.bf16 %v785_v13, %v782_v7  ;;  %v954_v34 = vpop.f32.mrf.mxu1 }
 0x310   :  { %2959 = vmatprep.mubr.bf16.mxu0 %v819_v14  ;;  %v2925_v36 = vpop.f32.mrf.mxu1 }
 0x311   :  { %2960 = vmatmul.mubr.bf16.gmra.mxu0 %v820_v15 }
 0x312   :  { %v967_v45 = vpop.f32.mrf.mxu1 }
 0x314   :  { %v2926_v53 = vpop.f32.mrf.mxu1 }
 0x316   :  { %v970_v2 = vpop.f32.mrf.mxu1 }
 0x318   :  { %v2929_v14 = vpop.f32.mrf.mxu1 }
 0x3b9   :  { %v2949_v35 = vpop.f32.mrf.mxu0 }
 0x3ba   :  { %v1089_v39 = vadd.f32 %v2949_v35, %v2917_v27 }
 0x3bb   :  { %v1080_v37 = vpop.f32.mrf.mxu0 }
 0x3bc   :  { %v1081_v38 = vadd.f32 %v1080_v37, %v935_v28  ;;  %v1152_v50 = vadd.f32 %v3931_v41, %v1089_v39 }
 0x3bd   :  { %v2950_v40 = vpop.f32.mrf.mxu0 }
 0x3be   :  { %v1092_v42 = vadd.f32 %v2950_v40, %v2918_v29  ;;  %v1150_v47 = vadd.f32 %v3931_v41, %v1081_v38  ;;  %v1168_v61 = vmax.f32 %v1152_v50, 0.0  ;;  %v983_v29 = vpop.f32.mrf.mxu1 }
 0x3bf   :  { %v1083_v46 = vpop.f32.mrf.mxu0 }
 0x3c0   :  { %v1153_v48 = vadd.f32 %v3931_v41, %v1092_v42  ;;  %v1084_v49 = vadd.f32 %v1083_v46, %v938_v30  ;;  %v1166_v56 = vmax.f32 %v1150_v47, 0.0  ;;  %v2930_v38 = vpop.f32.mrf.mxu1  ;;  %v3274_v42 = vld [vmem:[#allocation12 + $0x18] sm:$0xff]  }
 0x3c1   :  { %v2953_v51 = vpop.f32.mrf.mxu0 }
 0x3c2   :  { %v1151_v52 = vadd.f32 %v3931_v41, %v1084_v49  ;;  %v1169_v54 = vmax.f32 %v1153_v48, 0.0  ;;  %v1105_v62 = vadd.f32 %v2953_v51, %v2921_v31 }
 0x3c3   :  { %v1096_v55 = vpop.f32.mrf.mxu0 }
 0x3c4   :  { %v1167_v57 = vmax.f32 %v1151_v52, 0.0  ;;  %v1097_v58 = vadd.f32 %v1096_v55, %v951_v32  ;;  %v1183_v3 = vpack.c.bf16 %v1169_v54, %v1168_v61  ;;  %v1156_v9 = vadd.f32 %v3931_v41, %v1105_v62  ;;  %v3272_v32 = vld [vmem:[#allocation12 + $0x20] sm:$0xff]  }
 0x3c5   :  { %v2954_v63 = vpop.f32.mrf.mxu0 }
 0x3c6   :  { %v1108_v0 = vadd.f32 %v2954_v63, %v2922_v33  ;;  %v1182_v1 = vpack.c.bf16 %v1167_v57, %v1166_v56  ;;  %v1154_v6 = vadd.f32 %v3931_v41, %v1097_v58  ;;  %v1172_v22 = vmax.f32 %v1156_v9, 0.0  ;;  %v3280_v9 = vld [vmem:[#allocation12] sm:$0xff]  }
 0x3c7   :  { %v1099_v4 = vpop.f32.mrf.mxu0 }
 0x3c8   :  { %v1157_v7 = vadd.f32 %v3931_v41, %v1108_v0  ;;  %v1100_v8 = vadd.f32 %v1099_v4, %v954_v34  ;;  %2979 = vmatprep.mubr.bf16.mxu1 %v1182_v1  ;;  %v1170_v18 = vmax.f32 %v1154_v6, 0.0  ;;  %v3276_v6 = vld [vmem:[#allocation12 + $0x10] sm:$0xff]  }
 0x3c9   :  { %v2957_v10 = vpop.f32.mrf.mxu0  ;;  %2980 = vmatmul.mubr.bf16.vlgmr.msra.gmra.mxu1 %v1183_v3 }
 0x3ca   :  { %v1155_v13 = vadd.f32 %v3931_v41, %v1100_v8  ;;  %3028 = vmatpush3.bf16.msra.mxu1 %v3925_v20  ;;  %v1173_v15 = vmax.f32 %v1157_v7, 0.0  ;;  %v1121_v23 = vadd.f32 %v2957_v10, %v2925_v36  ;;  %v3277_v7 = vld [vmem:[#allocation9 + $0x8] sm:$0xff]   ;;  %v3281_v10 = vld [vmem:[#allocation13 + $0x38] sm:$0xff]  }
 0x3cb   :  { %v1112_v16 = vpop.f32.mrf.mxu0  ;;  %3029 = vmatprep.subr.bf16.mxu1 %v3268_v5  ;;  %v3278_v8 = vld [vmem:[#allocation12 + $0x8] sm:$0xff]  }
 0x3cc   :  { %v1171_v19 = vmax.f32 %v1155_v13, 0.0  ;;  %v1113_v21 = vadd.f32 %v1112_v16, %v967_v45  ;;  %v1185_v31 = vpack.c.bf16 %v1173_v15, %v1172_v22  ;;  %v1160_v35 = vadd.f32 %v3931_v41, %v1121_v23  ;;  %v3289_v13 = vld [vmem:[#allocation10 + $0x38] sm:$0xff]   ;;  %v3953_v16 = vld [vmem:[%s4220_s11] ss:$0 sm:$0xff] }
 0x3cd   :  { %v2958_v26 = vpop.f32.mrf.mxu0 }
 0x3ce   :  { %v1124_v27 = vadd.f32 %v2958_v26, %v2926_v53  ;;  %v1184_v28 = vpack.c.bf16 %v1171_v19, %v1170_v18  ;;  %3030 = vmatpush3.bf16.msra.mxu1 %v3268_v5  ;;  %v1158_v20 = vadd.f32 %v3931_v41, %v1113_v21  ;;  %v1176_v48 = vmax.f32 %v1160_v35, 0.0  ;;  %v986_v53 = vpop.f32.mrf.mxu1  ;;  %v3275_v5 = vld [vmem:[#allocation9 + $0x10] sm:$0xff]  }
 0x3cf   :  { %v1115_v30 = vpop.f32.mrf.mxu0  ;;  %3031 = vmatprep.subr.bf16.mxu1 %v3270_v17  ;;  %3005 = vmatprep.subr.bf16.mxu0 %v3275_v5  ;;  %v3290_v35 = vld [vmem:[#allocation10 + $0x30] sm:$0xff]  }
 0x3d0   :  { %v1161_v33 = vadd.f32 %v3931_v41, %v1124_v27  ;;  %v1116_v34 = vadd.f32 %v1115_v30, %v970_v2  ;;  %2983 = vmatprep.mubr.bf16.mxu1 %v1184_v28  ;;  %v1174_v45 = vmax.f32 %v1158_v20, 0.0  ;;  %3006 = vmatpush3.bf16.msra.mxu0 %v3275_v5 }
 0x3d1   :  { %v2961_v37 = vpop.f32.mrf.mxu0  ;;  %2984 = vmatmul.mubr.bf16.gmra.mxu1 %v1185_v31  ;;  %3007 = vmatprep.subr.bf16.mxu0 %v3277_v7 }
 0x3d2   :  { %v1159_v36 = vadd.f32 %v3931_v41, %v1116_v34  ;;  %3032 = vmatpush3.bf16.msra.mxu1 %v3270_v17  ;;  %v1177_v39 = vmax.f32 %v1161_v33, 0.0  ;;  %v1137_v49 = vadd.f32 %v2961_v37, %v2929_v14  ;;  %v3282_v34 = vld [vmem:[#allocation13 + $0x30] sm:$0xff]  }
 0x3d3   :  { %v1128_v40 = vpop.f32.mrf.mxu0  ;;  %3033 = vmatprep.subr.bf16.mxu1 %v3272_v32 }
 0x3d4   :  { %v1175_v46 = vmax.f32 %v1159_v36, 0.0  ;;  %v1129_v47 = vadd.f32 %v1128_v40, %v983_v29  ;;  %v1187_v55 = vpack.c.bf16 %v1177_v39, %v1176_v48  ;;  %v1164_v61 = vadd.f32 %v3931_v41, %v1137_v49  ;;  %3008 = vmatpush3.bf16.msra.mxu0 %v3277_v7 }
 0x3d5   :  { %v2962_v50 = vpop.f32.mrf.mxu0 }
 0x3d6   :  { %v1140_v51 = vadd.f32 %v2962_v50, %v2930_v38  ;;  %v1186_v52 = vpack.c.bf16 %v1175_v46, %v1174_v45  ;;  %3034 = vmatpush3.bf16.msra.mxu1 %v3272_v32  ;;  %v1162_v56 = vadd.f32 %v3931_v41, %v1129_v47  ;;  %v1180_v2 = vmax.f32 %v1164_v61, 0.0  ;;  %v3283_v46 = vld [vmem:[#allocation13 + $0x28] sm:$0xff]  }
 0x3d7   :  { %v1131_v54 = vpop.f32.mrf.mxu0  ;;  %3035 = vmatprep.subr.bf16.mxu1 %v3274_v42  ;;  %v3291_v47 = vld [vmem:[#allocation10 + $0x28] sm:$0xff]  }
 0x3d8   :  { %v1165_v57 = vadd.f32 %v3931_v41, %v1140_v51  ;;  %v1132_v58 = vadd.f32 %v1131_v54, %v986_v53  ;;  %2987 = vmatprep.mubr.bf16.mxu1 %v1186_v52  ;;  %v1178_v0 = vmax.f32 %v1162_v56, 0.0  ;;  %v3292_v56 = vld [vmem:[#allocation10 + $0x20] sm:$0xff]  }
 0x3d9   :  { %2988 = vmatmul.mubr.bf16.gmra.mxu1 %v1187_v55  ;;  %v3284_v55 = vld [vmem:[#allocation13 + $0x20] sm:$0xff]  }
 0x3da   :  { %v1163_v62 = vadd.f32 %v3931_v41, %v1132_v58  ;;  %3036 = vmatpush3.bf16.msra.mxu1 %v3274_v42  ;;  %v1181_v63 = vmax.f32 %v1165_v57, 0.0  ;;  %v3279_v41 = vld [vmem:[#allocation9] sm:$0xff]  }
 0x3db   :  { %3037 = vmatprep.subr.bf16.mxu1 %v3276_v6  ;;  %3009 = vmatprep.subr.bf16.mxu0 %v3279_v41 }
 0x3dc   :  { %v1179_v1 = vmax.f32 %v1163_v62, 0.0  ;;  %v1189_v4 = vpack.c.bf16 %v1181_v63, %v1180_v2  ;;  %3010 = vmatpush3.bf16.msra.mxu0 %v3279_v41  ;;  %v3285_v2 = vld [vmem:[#allocation13 + $0x18] sm:$0xff]  }
 0x3dd   :  { %3059 = vmatprep.subr.bf16.mxu0 %v3289_v13 }
 0x3de   :  { %v1188_v3 = vpack.c.bf16 %v1179_v1, %v1178_v0  ;;  %3038 = vmatpush3.bf16.msra.mxu1 %v3276_v6 }
 0x3df   :  { %3039 = vmatprep.subr.bf16.mxu1 %v3278_v8 }
 0x3e0   :  { %2991 = vmatprep.mubr.bf16.mxu1 %v1188_v3  ;;  %v3293_v3 = vld [vmem:[#allocation10 + $0x18] sm:$0xff]  }
 0x3e1   :  { %2992 = vmatmul.mubr.bf16.gmra.mxu1 %v1189_v4 }
 0x3e2   :  { %3040 = vmatpush3.bf16.msra.mxu1 %v3278_v8 }
 0x3e3   :  { %3041 = vmatprep.subr.bf16.mxu1 %v3280_v9 }
 0x3e6   :  { %3042 = vmatpush3.bf16.msra.mxu1 %v3280_v9 }
 0x3e7   :  { %3091 = vmatprep.subr.bf16.mxu1 %v3281_v10 }
 0x489   :  { %v2981_v14 = vpop.f32.mrf.mxu1 }
 0x48a   :  { %v1304_v21 = vadd.f32 %v2981_v14, %v3953_v16 }
 0x48b   :  { %v1295_v15 = vpop.f32.mrf.mxu1 }
 0x48c   :  { %v1296_v18 = vadd.f32 %v3953_v16, %v1295_v15  ;;  %v1360_v30 = vmax.f32 %v1304_v21, 0.0 }
 0x48d   :  { %v2982_v17 = vpop.f32.mrf.mxu1 }
 0x48e   :  { %v1307_v19 = vadd.f32 %v2982_v17, %v3953_v16  ;;  %v1358_v28 = vmax.f32 %v1296_v18, 0.0 }
 0x48f   :  { %v1298_v22 = vpop.f32.mrf.mxu1 }
 0x490   :  { %v1299_v23 = vadd.f32 %v3953_v16, %v1298_v22  ;;  %v1361_v26 = vmax.f32 %v1307_v19, 0.0  ;;  %v3287_v22 = vld [vmem:[#allocation13 + $0x8] sm:$0xff]  }
 0x491   :  { %v2985_v27 = vpop.f32.mrf.mxu1 }
 0x492   :  { %v1359_v29 = vmax.f32 %v1299_v23, 0.0  ;;  %v1375_v20 = vpack.c.bf16 %v1361_v26, %v1360_v30  ;;  %v1320_v38 = vadd.f32 %v2985_v27, %v3953_v16  ;;  %v3288_v30 = vld [vmem:[#allocation13] sm:$0xff]  }
 0x493   :  { %v1311_v31 = vpop.f32.mrf.mxu1 }
 0x494   :  { %v1374_v32 = vpack.c.bf16 %v1359_v29, %v1358_v28  ;;  %v1312_v37 = vadd.f32 %v3953_v16, %v1311_v31  ;;  %v1364_v50 = vmax.f32 %v1320_v38, 0.0  ;;  %v3297_v31 = vld [vmem:[#allocation15 + $0x38] sm:$0xff]   ;;  %v3298_v38 = vld [vmem:[#allocation15 + $0x30] sm:$0xff]  }
 0x495   :  { %v2986_v33 = vpop.f32.mrf.mxu1 }
 0x496   :  { %v1323_v36 = vadd.f32 %v2986_v33, %v3953_v16  ;;  %3011 = vmatprep.mubr.bf16.mxu0 %v1374_v32  ;;  %3043 = vmatprep.mubr.bf16.mxu1 %v1374_v32  ;;  %v1362_v48 = vmax.f32 %v1312_v37, 0.0 }
 0x497   :  { %v1314_v39 = vpop.f32.mrf.mxu1  ;;  %3012 = vmatmul.mubr.bf16.vlgmr.msra.gmra.mxu0 %v1375_v20  ;;  %3044 = vmatmul.mubr.bf16.vlgmr.msra.gmra.mxu1 %v1375_v20 }
 0x498   :  { %v1315_v40 = vadd.f32 %v3953_v16, %v1314_v39  ;;  %3092 = vmatpush3.bf16.msra.mxu1 %v3281_v10  ;;  %3060 = vmatpush3.bf16.msra.mxu0 %v3289_v13  ;;  %v1365_v42 = vmax.f32 %v1323_v36, 0.0  ;;  %v3286_v10 = vld [vmem:[#allocation13 + $0x10] sm:$0xff]  }
 0x499   :  { %v2989_v45 = vpop.f32.mrf.mxu1  ;;  %3093 = vmatprep.subr.bf16.mxu1 %v3282_v34  ;;  %3061 = vmatprep.subr.bf16.mxu0 %v3290_v35  ;;  %v3294_v13 = vld [vmem:[#allocation10 + $0x10] sm:$0xff]  }
 0x49a   :  { %v1363_v49 = vmax.f32 %v1315_v40, 0.0  ;;  %v1377_v53 = vpack.c.bf16 %v1365_v42, %v1364_v50  ;;  %v1336_v61 = vadd.f32 %v2989_v45, %v3953_v16 }
 0x49b   :  { %v1327_v51 = vpop.f32.mrf.mxu1 }
 0x49c   :  { %v1376_v52 = vpack.c.bf16 %v1363_v49, %v1362_v48  ;;  %3094 = vmatpush3.bf16.msra.mxu1 %v3282_v34  ;;  %3062 = vmatpush3.bf16.msra.mxu0 %v3290_v35  ;;  %v1328_v57 = vadd.f32 %v3953_v16, %v1327_v51  ;;  %v1368_v6 = vmax.f32 %v1336_v61, 0.0 }
 0x49d   :  { %v2990_v54 = vpop.f32.mrf.mxu1  ;;  %3095 = vmatprep.subr.bf16.mxu1 %v3283_v46  ;;  %3063 = vmatprep.subr.bf16.mxu0 %v3291_v47 }
 0x49e   :  { %v1339_v58 = vadd.f32 %v2990_v54, %v3953_v16  ;;  %3015 = vmatprep.mubr.bf16.mxu0 %v1376_v52  ;;  %3047 = vmatprep.mubr.bf16.mxu1 %v1376_v52  ;;  %v1366_v4 = vmax.f32 %v1328_v57, 0.0 }
 0x49f   :  { %v1330_v62 = vpop.f32.mrf.mxu1  ;;  %3016 = vmatmul.mubr.bf16.gmra.mxu0 %v1377_v53  ;;  %3048 = vmatmul.mubr.bf16.gmra.mxu1 %v1377_v53  ;;  %v3300_v53 = vld [vmem:[#allocation15 + $0x20] sm:$0xff]  }
 0x4a0   :  { %v1331_v63 = vadd.f32 %v3953_v16, %v1330_v62  ;;  %3096 = vmatpush3.bf16.msra.mxu1 %v3283_v46  ;;  %3064 = vmatpush3.bf16.msra.mxu0 %v3291_v47  ;;  %v1369_v0 = vmax.f32 %v1339_v58, 0.0  ;;  %v3299_v46 = vld [vmem:[#allocation15 + $0x28] sm:$0xff]  }
 0x4a1   :  { %v2993_v1 = vpop.f32.mrf.mxu1  ;;  %3097 = vmatprep.subr.bf16.mxu1 %v3284_v55  ;;  %3065 = vmatprep.subr.bf16.mxu0 %v3292_v56 }
 0x4a2   :  { %v1367_v5 = vmax.f32 %v1331_v63, 0.0  ;;  %v1379_v41 = vpack.c.bf16 %v1369_v0, %v1368_v6  ;;  %v1352_v17 = vadd.f32 %v2993_v1, %v3953_v16 }
 0x4a3   :  { %v1343_v7 = vpop.f32.mrf.mxu1 }
 0x4a4   :  { %v1378_v8 = vpack.c.bf16 %v1367_v5, %v1366_v4  ;;  %3098 = vmatpush3.bf16.msra.mxu1 %v3284_v55  ;;  %3066 = vmatpush3.bf16.msra.mxu0 %v3292_v56  ;;  %v1344_v14 = vadd.f32 %v3953_v16, %v1343_v7  ;;  %v1372_v27 = vmax.f32 %v1352_v17, 0.0  ;;  %v4064_v17 = vld [vmem:[#allocation16 + $0x38] sm:$0xff]  }
 0x4a5   :  { %v2994_v9 = vpop.f32.mrf.mxu1  ;;  %3099 = vmatprep.subr.bf16.mxu1 %v3285_v2  ;;  %3067 = vmatprep.subr.bf16.mxu0 %v3293_v3 }
 0x4a6   :  { %v1355_v15 = vadd.f32 %v2994_v9, %v3953_v16  ;;  %3019 = vmatprep.mubr.bf16.mxu0 %v1378_v8  ;;  %3051 = vmatprep.mubr.bf16.mxu1 %v1378_v8  ;;  %v1370_v23 = vmax.f32 %v1344_v14, 0.0  ;;  %v3302_v9 = vld [vmem:[#allocation15 + $0x10] sm:$0xff]  }
 0x4a7   :  { %v1346_v18 = vpop.f32.mrf.mxu1  ;;  %3020 = vmatmul.mubr.bf16.gmra.mxu0 %v1379_v41  ;;  %3052 = vmatmul.mubr.bf16.gmra.mxu1 %v1379_v41  ;;  %v3301_v41 = vld [vmem:[#allocation15 + $0x18] sm:$0xff]  }
 0x4a8   :  { %v1347_v19 = vadd.f32 %v3953_v16, %v1346_v18  ;;  %3100 = vmatpush3.bf16.msra.mxu1 %v3285_v2  ;;  %3068 = vmatpush3.bf16.msra.mxu0 %v3293_v3  ;;  %v1373_v21 = vmax.f32 %v1355_v15, 0.0  ;;  %v3295_v16 = vld [vmem:[#allocation10 + $0x8] sm:$0xff]  }
 0x4a9   :  { %3101 = vmatprep.subr.bf16.mxu1 %v3286_v10  ;;  %3069 = vmatprep.subr.bf16.mxu0 %v3294_v13 }
 0x4aa   :  { %v1371_v26 = vmax.f32 %v1347_v19, 0.0  ;;  %v1381_v29 = vpack.c.bf16 %v1373_v21, %v1372_v27  ;;  %v4067_v19 = vld [vmem:[#allocation16 + $0x30] sm:$0xff]  }
 0x4ac   :  { %v1380_v28 = vpack.c.bf16 %v1371_v26, %v1370_v23  ;;  %3102 = vmatpush3.bf16.msra.mxu1 %v3286_v10  ;;  %3070 = vmatpush3.bf16.msra.mxu0 %v3294_v13  ;;  %v3303_v10 = vld [vmem:[#allocation15 + $0x8] sm:$0xff]   ;;  %v3304_v13 = vld [vmem:[#allocation15] sm:$0xff]  }
 0x4ad   :  { %3103 = vmatprep.subr.bf16.mxu1 %v3287_v22  ;;  %3071 = vmatprep.subr.bf16.mxu0 %v3295_v16  ;;  %v4076_v26 = vld [vmem:[#allocation16 + $0x20] sm:$0xff]  }
 0x4ae   :  { %3023 = vmatprep.mubr.bf16.mxu0 %v1380_v28  ;;  %3055 = vmatprep.mubr.bf16.mxu1 %v1380_v28  ;;  %v4080_v28 = vld [vmem:[#allocation16 + $0x18] sm:$0xff]  }
 0x4af   :  { %3024 = vmatmul.mubr.bf16.gmra.mxu0 %v1381_v29  ;;  %3056 = vmatmul.mubr.bf16.gmra.mxu1 %v1381_v29 }
 0x4b0   :  { %3104 = vmatpush3.bf16.msra.mxu1 %v3287_v22  ;;  %3107 = vmatprep.mubr.bf16.mxu1 %v3814_v43  ;;  %v3296_v43 = vld [vmem:[#allocation10] sm:$0xff]   ;;  %v4072_v22 = vld [vmem:[#allocation16 + $0x28] sm:$0xff]  }
 0x4b1   :  { %3105 = vmatprep.subr.bf16.mxu1 %v3288_v30  ;;  %3072 = vmatpush3.bf16.msra.mxu0 %v3295_v16 }
 0x4b2   :  { %3073 = vmatprep.subr.bf16.mxu0 %v3296_v43 }
 0x4b4   :  { %3106 = vmatpush3.bf16.msra.mxu1 %v3288_v30 }
 0x4b5   :  { %3074 = vmatpush3.bf16.msra.mxu0 %v3296_v43  ;;  %3187 = vmatprep.subr.bf16.mxu1 %v4064_v17 }
 0x4b6   :  { %3123 = vmatprep.subr.bf16.mxu0 %v3297_v31 }
 0x4b7   :  { %3108 = vmatmul.mubr.bf16.vlgmr.msra.gmra.mxu1 %v3816_v44  ;;  %v3982_v44 = vld [vmem:[%s4222_s13] ss:$0 sm:$0xff] }
 0x4b8   :  { %3111 = vmatprep.mubr.bf16.mxu1 %v3826_v59  ;;  %3195 = vmatpush3.bf16.msra.mxu1 %v4064_v17 }
 0x4b9   :  { %3188 = vmatprep.subr.bf16.mxu1 %v4067_v19 }
 0x4bc   :  { %3196 = vmatpush3.bf16.msra.mxu1 %v4067_v19 }
 0x4bd   :  { %3189 = vmatprep.subr.bf16.mxu1 %v4072_v22 }
 0x4bf   :  { %3112 = vmatmul.mubr.bf16.gmra.mxu1 %v3828_v60 }
 0x4c0   :  { %3115 = vmatprep.mubr.bf16.mxu1 %v3838_v11  ;;  %3197 = vmatpush3.bf16.msra.mxu1 %v4072_v22 }
 0x4c1   :  { %3190 = vmatprep.subr.bf16.mxu1 %v4076_v26 }
 0x4c4   :  { %3198 = vmatpush3.bf16.msra.mxu1 %v4076_v26 }
 0x4c5   :  { %3191 = vmatprep.subr.bf16.mxu1 %v4080_v28 }
 0x4c7   :  { %3116 = vmatmul.mubr.bf16.gmra.mxu1 %v3840_v12 }
 0x4c8   :  { %3119 = vmatprep.mubr.bf16.mxu1 %v3850_v24  ;;  %3199 = vmatpush3.bf16.msra.mxu1 %v4080_v28 }
 0x4cf   :  { %3120 = vmatmul.mubr.bf16.gmra.mxu1 %v3852_v25 }
 0x557   :  { %v3013_v59 = vpop.f32.mrf.mxu0  ;;  %v3045_v14 = vpop.f32.mrf.mxu1 }
 0x558   :  { %v1496_v60 = vadd.f32 %v3013_v59, %v3982_v44 }
 0x559   :  { %v1487_v11 = vpop.f32.mrf.mxu0  ;;  %v1688_v15 = vpop.f32.mrf.mxu1 }
 0x55a   :  { %1552 = vst.msk [vmem:[%s4232_s23 + $0x10] sm:$0xff] %vm796_vm1, %v1496_v60  ;;  %v1488_v12 = vadd.f32 %v3982_v44, %v1487_v11 }
 0x55b   :  { %v3014_v24 = vpop.f32.mrf.mxu0  ;;  %v3046_v18 = vpop.f32.mrf.mxu1 }
 0x55c   :  { %1550 = vst.msk [vmem:[%s4232_s23] sm:$0xff] %vm796_vm1, %v1488_v12  ;;  %v1499_v25 = vadd.f32 %v3014_v24, %v3982_v44 }
 0x55d   :  { %v1490_v32 = vpop.f32.mrf.mxu0  ;;  %v1691_v21 = vpop.f32.mrf.mxu1 }
 0x55e   :  { %1553 = vst.msk [vmem:[%s4232_s23 + $0x18] sm:$0xff] %vm796_vm1, %v1499_v25  ;;  %v1491_v20 = vadd.f32 %v3982_v44, %v1490_v32  ;;  %v1567_v37 = vpack.c.bf16 %v1499_v25, %v1496_v60 }
 0x55f   :  { %v3017_v33 = vpop.f32.mrf.mxu0  ;;  %v3049_v23 = vpop.f32.mrf.mxu1 }
 0x560   :  { %1551 = vst.msk [vmem:[%s4232_s23 + $0x8] sm:$0xff] %vm796_vm1, %v1491_v20  ;;  %v1566_v34 = vpack.c.bf16 %v1491_v20, %v1488_v12  ;;  %v1512_v35 = vadd.f32 %v3017_v33, %v3982_v44 }
 0x561   :  { %v1503_v36 = vpop.f32.mrf.mxu0  ;;  %v1704_v27 = vpop.f32.mrf.mxu1 }
 0x562   :  { %1556 = vst.msk [vmem:[%s4232_s23 + $0x30] sm:$0xff] %vm796_vm1, %v1512_v35  ;;  %v1504_v39 = vadd.f32 %v3982_v44, %v1503_v36  ;;  %3075 = vmatprep.mubr.bf16.mxu0 %v1566_v34 }
 0x563   :  { %v3018_v40 = vpop.f32.mrf.mxu0  ;;  %3076 = vmatmul.mubr.bf16.vlgmr.msra.gmra.mxu0 %v1567_v37  ;;  %v3050_v29 = vpop.f32.mrf.mxu1 }
 0x564   :  { %1554 = vst.msk [vmem:[%s4232_s23 + $0x20] sm:$0xff] %vm796_vm1, %v1504_v39  ;;  %v1515_v42 = vadd.f32 %v3018_v40, %v3982_v44  ;;  %3124 = vmatpush3.bf16.msra.mxu0 %v3297_v31 }
 0x565   :  { %v1506_v45 = vpop.f32.mrf.mxu0  ;;  %3125 = vmatprep.subr.bf16.mxu0 %v3298_v38  ;;  %v1707_v30 = vpop.f32.mrf.mxu1 }
 0x566   :  { %1557 = vst.msk [vmem:[%s4232_s23 + $0x38] sm:$0xff] %vm796_vm1, %v1515_v42  ;;  %v1507_v47 = vadd.f32 %v3982_v44, %v1506_v45  ;;  %v1569_v51 = vpack.c.bf16 %v1515_v42, %v1512_v35 }
 0x567   :  { %v3021_v48 = vpop.f32.mrf.mxu0  ;;  %v4085_v16 = vpop.f32.mrf.mxu1 }
 0x568   :  { %1555 = vst.msk [vmem:[%s4232_s23 + $0x28] sm:$0xff] %vm796_vm1, %v1507_v47  ;;  %v1568_v49 = vpack.c.bf16 %v1507_v47, %v1504_v39  ;;  %v1528_v50 = vadd.f32 %v3021_v48, %v3982_v44  ;;  %3126 = vmatpush3.bf16.msra.mxu0 %v3298_v38 }
 0x569   :  { %v1519_v52 = vpop.f32.mrf.mxu0  ;;  %3127 = vmatprep.subr.bf16.mxu0 %v3299_v46  ;;  %v4087_v43 = vpop.f32.mrf.mxu1 }
 0x56a   :  { %1560 = vst.msk [vmem:[%s4232_s23 + $0x50] sm:$0xff] %vm796_vm1, %v1528_v50  ;;  %v1520_v54 = vadd.f32 %v3982_v44, %v1519_v52  ;;  %3079 = vmatprep.mubr.bf16.mxu0 %v1568_v49 }
 0x56b   :  { %v3022_v55 = vpop.f32.mrf.mxu0  ;;  %3080 = vmatmul.mubr.bf16.gmra.mxu0 %v1569_v51  ;;  %v4089_v31 = vpop.f32.mrf.mxu1 }
 0x56c   :  { %1558 = vst.msk [vmem:[%s4232_s23 + $0x40] sm:$0xff] %vm796_vm1, %v1520_v54  ;;  %v1531_v56 = vadd.f32 %v3022_v55, %v3982_v44  ;;  %3128 = vmatpush3.bf16.msra.mxu0 %v3299_v46 }
 0x56d   :  { %v1522_v57 = vpop.f32.mrf.mxu0  ;;  %3129 = vmatprep.subr.bf16.mxu0 %v3300_v53 }
 0x56e   :  { %1561 = vst.msk [vmem:[%s4232_s23 + $0x58] sm:$0xff] %vm796_vm1, %v1531_v56  ;;  %v1523_v58 = vadd.f32 %v3982_v44, %v1522_v57  ;;  %v1571_v0 = vpack.c.bf16 %v1531_v56, %v1528_v50  ;;  %v4104_v50 = vld [vmem:[%s4226_s17] ss:$0 sm:$0xff] }
 0x56f   :  { %v3025_v61 = vpop.f32.mrf.mxu0 }
 0x570   :  { %1559 = vst.msk [vmem:[%s4232_s23 + $0x48] sm:$0xff] %vm796_vm1, %v1523_v58  ;;  %v1570_v62 = vpack.c.bf16 %v1523_v58, %v1520_v54  ;;  %v1544_v63 = vadd.f32 %v3025_v61, %v3982_v44  ;;  %3130 = vmatpush3.bf16.msra.mxu0 %v3300_v53 }
 0x571   :  { %v1535_v1 = vpop.f32.mrf.mxu0  ;;  %3131 = vmatprep.subr.bf16.mxu0 %v3301_v41 }
 0x572   :  { %1564 = vst.msk [vmem:[%s4232_s23 + $0x70] sm:$0xff] %vm796_vm1, %v1544_v63  ;;  %v1536_v2 = vadd.f32 %v3982_v44, %v1535_v1  ;;  %3083 = vmatprep.mubr.bf16.mxu0 %v1570_v62 }
 0x573   :  { %v3026_v3 = vpop.f32.mrf.mxu0  ;;  %3084 = vmatmul.mubr.bf16.gmra.mxu0 %v1571_v0 }
 0x574   :  { %1562 = vst.msk [vmem:[%s4232_s23 + $0x60] sm:$0xff] %vm796_vm1, %v1536_v2  ;;  %v1547_v4 = vadd.f32 %v3026_v3, %v3982_v44  ;;  %3132 = vmatpush3.bf16.msra.mxu0 %v3301_v41 }
 0x575   :  { %v1538_v5 = vpop.f32.mrf.mxu0  ;;  %3133 = vmatprep.subr.bf16.mxu0 %v3302_v9 }
 0x576   :  { %1565 = vst.msk [vmem:[%s4232_s23 + $0x78] sm:$0xff] %vm796_vm1, %v1547_v4  ;;  %v1539_v6 = vadd.f32 %v3982_v44, %v1538_v5  ;;  %v1573_v8 = vpack.c.bf16 %v1547_v4, %v1544_v63  ;;  %v4091_v44 = vpop.f32.mrf.mxu1 }
 0x578   :  { %1563 = vst.msk [vmem:[%s4232_s23 + $0x68] sm:$0xff] %vm796_vm1, %v1539_v6  ;;  %v1572_v7 = vpack.c.bf16 %v1539_v6, %v1536_v2  ;;  %3134 = vmatpush3.bf16.msra.mxu0 %v3302_v9  ;;  %v4093_v59 = vpop.f32.mrf.mxu1 }
 0x579   :  { %3135 = vmatprep.subr.bf16.mxu0 %v3303_v10 }
 0x57a   :  { %3087 = vmatprep.mubr.bf16.mxu0 %v1572_v7  ;;  %v4095_v60 = vpop.f32.mrf.mxu1 }
 0x57b   :  { %3088 = vmatmul.mubr.bf16.gmra.mxu0 %v1573_v8 }
 0x57c   :  { %3136 = vmatpush3.bf16.msra.mxu0 %v3303_v10  ;;  %v4097_v11 = vpop.f32.mrf.mxu1 }
 0x57d   :  { %3137 = vmatprep.subr.bf16.mxu0 %v3304_v13 }
 0x57e   :  { %v4099_v12 = vpop.f32.mrf.mxu1 }
 0x580   :  { %3138 = vmatpush3.bf16.msra.mxu0 %v3304_v13  ;;  %v3109_v24 = vpop.f32.mrf.mxu1 }
 0x581   :  { %3155 = vmatprep.subr.bf16.mxu0 %v4064_v17 }
 0x582   :  { %v1994_v25 = vpop.f32.mrf.mxu1 }
 0x584   :  { %v3110_v32 = vpop.f32.mrf.mxu1 }
 0x586   :  { %v1997_v20 = vpop.f32.mrf.mxu1 }
 0x588   :  { %v3113_v33 = vpop.f32.mrf.mxu1 }
 0x58a   :  { %v2010_v34 = vpop.f32.mrf.mxu1 }
 0x58c   :  { %v3114_v35 = vpop.f32.mrf.mxu1 }
 0x58e   :  { %v2013_v37 = vpop.f32.mrf.mxu1 }
 0x590   :  { %v3117_v42 = vpop.f32.mrf.mxu1 }
 0x592   :  { %v2026_v53 = vpop.f32.mrf.mxu1 }
 0x594   :  { %v3118_v1 = vpop.f32.mrf.mxu1 }
 0x623   :  { %v3077_v36 = vpop.f32.mrf.mxu0 }
 0x624   :  { %v1842_v38 = vadd.f32 %v3077_v36, %v3045_v14  ;;  %v2029_v14 = vpop.f32.mrf.mxu1 }
 0x625   :  { %v1833_v39 = vpop.f32.mrf.mxu0 }
 0x626   :  { %v1834_v40 = vadd.f32 %v1833_v39, %v1688_v15  ;;  %v2059_v48 = vadd.f32 %v3109_v24, %v1842_v38 }
 0x627   :  { %v3078_v45 = vpop.f32.mrf.mxu0 }
 0x628   :  { %v2057_v46 = vadd.f32 %v1994_v25, %v1834_v40  ;;  %v1845_v47 = vadd.f32 %v3078_v45, %v3046_v18  ;;  %v2082_v58 = vadd.f32 %v4104_v50, %v2059_v48 }
 0x629   :  { %v1836_v49 = vpop.f32.mrf.mxu0 }
 0x62a   :  { %v2060_v51 = vadd.f32 %v3110_v32, %v1845_v47  ;;  %v1837_v52 = vadd.f32 %v1836_v49, %v1691_v21  ;;  %v2080_v55 = vadd.f32 %v4104_v50, %v2057_v46  ;;  %v2098_v6 = vmax.f32 %v2082_v58, 0.0 }
 0x62b   :  { %v3081_v54 = vpop.f32.mrf.mxu0 }
 0x62c   :  { %v2083_v56 = vadd.f32 %v4104_v50, %v2060_v51  ;;  %v2058_v57 = vadd.f32 %v1997_v20, %v1837_v52  ;;  %v1858_v63 = vadd.f32 %v3081_v54, %v3049_v23  ;;  %v2096_v4 = vmax.f32 %v2080_v55, 0.0 }
 0x62d   :  { %v1849_v61 = vpop.f32.mrf.mxu0 }
 0x62e   :  { %v2081_v62 = vadd.f32 %v4104_v50, %v2058_v57  ;;  %v1850_v0 = vadd.f32 %v1849_v61, %v1704_v27  ;;  %v2099_v2 = vmax.f32 %v2083_v56, 0.0  ;;  %v2063_v9 = vadd.f32 %v3113_v33, %v1858_v63  ;;  %v3121_v33 = vpop.f32.mrf.mxu1 }
 0x62f   :  { %v3082_v3 = vpop.f32.mrf.mxu0 }
 0x630   :  { %v2097_v5 = vmax.f32 %v2081_v62, 0.0  ;;  %v2061_v7 = vadd.f32 %v2010_v34, %v1850_v0  ;;  %v1861_v8 = vadd.f32 %v3082_v3, %v3050_v29  ;;  %v2113_v15 = vpack.c.bf16 %v2099_v2, %v2098_v6 }
 0x631   :  { %v1852_v41 = vpop.f32.mrf.mxu0  ;;  %v2086_v32 = vadd.f32 %v4104_v50, %v2063_v9 }
 0x632   :  { %v1853_v10 = vadd.f32 %v1852_v41, %v1707_v30  ;;  %v2112_v13 = vpack.c.bf16 %v2097_v5, %v2096_v4  ;;  %v2064_v18 = vadd.f32 %v3114_v35, %v1861_v8  ;;  %v2084_v23 = vadd.f32 %v4104_v50, %v2061_v7 }
 0x633   :  { %v3085_v21 = vpop.f32.mrf.mxu0  ;;  %v2102_v45 = vmax.f32 %v2086_v32, 0.0 }
 0x634   :  { %v2062_v24 = vadd.f32 %v2013_v37, %v1853_v10  ;;  %3139 = vmatprep.mubr.bf16.mxu0 %v2112_v13  ;;  %v2087_v27 = vadd.f32 %v4104_v50, %v2064_v18  ;;  %v1874_v20 = vadd.f32 %v3085_v21, %v4085_v16  ;;  %v2100_v38 = vmax.f32 %v2084_v23, 0.0  ;;  %v2611_v21 = vld [vmem:[%s4228_s19] ss:$0 sm:$0xff] }
 0x635   :  { %v1865_v25 = vpop.f32.mrf.mxu0  ;;  %3140 = vmatmul.mubr.bf16.vlgmr.msra.gmra.mxu0 %v2113_v15  ;;  %v3311_v15 = vld [vmem:[#allocation16 + $0x8] sm:$0xff]  }
 0x636   :  { %v2085_v29 = vadd.f32 %v4104_v50, %v2062_v24  ;;  %v1866_v30 = vadd.f32 %v1865_v25, %v4087_v43  ;;  %3156 = vmatpush3.bf16.msra.mxu0 %v4064_v17  ;;  %v2103_v35 = vmax.f32 %v2087_v27, 0.0  ;;  %v2067_v46 = vadd.f32 %v3117_v42, %v1874_v20  ;;  %v2042_v43 = vpop.f32.mrf.mxu1 }
 0x637   :  { %v3086_v34 = vpop.f32.mrf.mxu0  ;;  %3157 = vmatprep.subr.bf16.mxu0 %v4067_v19 }
 0x638   :  { %v2101_v37 = vmax.f32 %v2085_v29, 0.0  ;;  %v1877_v36 = vadd.f32 %v3086_v34, %v4089_v31  ;;  %v2065_v39 = vadd.f32 %v2026_v53, %v1866_v30  ;;  %v2115_v52 = vpack.c.bf16 %v2103_v35, %v2102_v45  ;;  %v3122_v55 = vpop.f32.mrf.mxu1 }
 0x639   :  { %v1868_v40 = vpop.f32.mrf.mxu0  ;;  %v2090_v42 = vadd.f32 %v4104_v50, %v2067_v46 }
 0x63a   :  { %v2068_v47 = vadd.f32 %v3118_v1, %v1877_v36  ;;  %v1869_v16 = vadd.f32 %v1868_v40, %v4091_v44  ;;  %3158 = vmatpush3.bf16.msra.mxu0 %v4067_v19  ;;  %v2114_v48 = vpack.c.bf16 %v2101_v37, %v2100_v38  ;;  %v2088_v31 = vadd.f32 %v4104_v50, %v2065_v39 }
 0x63b   :  { %v3089_v17 = vpop.f32.mrf.mxu0  ;;  %3159 = vmatprep.subr.bf16.mxu0 %v4072_v22  ;;  %v2106_v1 = vmax.f32 %v2090_v42, 0.0 }
 0x63c   :  { %v2091_v49 = vadd.f32 %v4104_v50, %v2068_v47  ;;  %v2066_v51 = vadd.f32 %v2029_v14, %v1869_v16  ;;  %3143 = vmatprep.mubr.bf16.mxu0 %v2114_v48  ;;  %v1890_v44 = vadd.f32 %v3089_v17, %v4093_v59  ;;  %v2104_v63 = vmax.f32 %v2088_v31, 0.0  ;;  %v3310_v14 = vld [vmem:[#allocation16 + $0x10] sm:$0xff]  }
 0x63d   :  { %v1881_v53 = vpop.f32.mrf.mxu0  ;;  %3144 = vmatmul.mubr.bf16.gmra.mxu0 %v2115_v52  ;;  %3192 = vmatprep.subr.bf16.mxu1 %v3310_v14 }
 0x63e   :  { %v2089_v54 = vadd.f32 %v4104_v50, %v2066_v51  ;;  %v1882_v19 = vadd.f32 %v1881_v53, %v4095_v60  ;;  %3160 = vmatpush3.bf16.msra.mxu0 %v4072_v22  ;;  %v2107_v57 = vmax.f32 %v2091_v49, 0.0  ;;  %v2071_v2 = vadd.f32 %v3121_v33, %v1890_v44  ;;  %v2045_v60 = vpop.f32.mrf.mxu1  ;;  %3200 = vmatpush3.bf16.msra.mxu1 %v3310_v14 }
 0x63f   :  { %v3090_v56 = vpop.f32.mrf.mxu0  ;;  %3161 = vmatprep.subr.bf16.mxu0 %v4076_v26  ;;  %3193 = vmatprep.subr.bf16.mxu1 %v3311_v15 }
 0x640   :  { %v2105_v58 = vmax.f32 %v2089_v54, 0.0  ;;  %v2069_v61 = vadd.f32 %v2042_v43, %v1882_v19  ;;  %v1893_v62 = vadd.f32 %v3090_v56, %v4097_v11  ;;  %v2117_v7 = vpack.c.bf16 %v2107_v57, %v2106_v1 }
 0x641   :  { %v1884_v0 = vpop.f32.mrf.mxu0  ;;  %v2094_v11 = vadd.f32 %v4104_v50, %v2071_v2 }
 0x642   :  { %v2072_v3 = vadd.f32 %v3122_v55, %v1893_v62  ;;  %v1885_v59 = vadd.f32 %v1884_v0, %v4099_v12  ;;  %v2116_v4 = vpack.c.bf16 %v2105_v58, %v2104_v63  ;;  %3162 = vmatpush3.bf16.msra.mxu0 %v4076_v26  ;;  %v2092_v22 = vadd.f32 %v4104_v50, %v2069_v61 }
 0x643   :  { %3163 = vmatprep.subr.bf16.mxu0 %v4080_v28  ;;  %v2110_v26 = vmax.f32 %v2094_v11, 0.0  ;;  %3201 = vmatpush3.bf16.msra.mxu1 %v3311_v15 }
 0x644   :  { %v2095_v5 = vadd.f32 %v4104_v50, %v2072_v3  ;;  %v2070_v6 = vadd.f32 %v2045_v60, %v1885_v59  ;;  %3147 = vmatprep.mubr.bf16.mxu0 %v2116_v4  ;;  %v2108_v12 = vmax.f32 %v2092_v22, 0.0 }
 0x645   :  { %3148 = vmatmul.mubr.bf16.gmra.mxu0 %v2117_v7 }
 0x646   :  { %v2093_v8 = vadd.f32 %v4104_v50, %v2070_v6  ;;  %3164 = vmatpush3.bf16.msra.mxu0 %v4080_v28  ;;  %v2111_v41 = vmax.f32 %v2095_v5, 0.0  ;;  %v3312_v50 = vld [vmem:[#allocation16] sm:$0xff]  }
 0x647   :  { %3165 = vmatprep.subr.bf16.mxu0 %v3310_v14  ;;  %3194 = vmatprep.subr.bf16.mxu1 %v3312_v50 }
 0x648   :  { %v2109_v9 = vmax.f32 %v2093_v8, 0.0  ;;  %v2119_v13 = vpack.c.bf16 %v2111_v41, %v2110_v26  ;;  %3202 = vmatpush3.bf16.msra.mxu1 %v3312_v50 }
 0x64a   :  { %v2118_v10 = vpack.c.bf16 %v2109_v9, %v2108_v12  ;;  %3166 = vmatpush3.bf16.msra.mxu0 %v3310_v14  ;;  %v2620_v9 = vld [vmem:[%s4230_s21] ss:$0 sm:$0xff] }
 0x64b   :  { %3167 = vmatprep.subr.bf16.mxu0 %v3311_v15 }
 0x64c   :  { %3151 = vmatprep.mubr.bf16.mxu0 %v2118_v10 }
 0x64d   :  { %3152 = vmatmul.mubr.bf16.gmra.mxu0 %v2119_v13 }
 0x64e   :  { %3168 = vmatpush3.bf16.msra.mxu0 %v3311_v15 }
 0x64f   :  { %3169 = vmatprep.subr.bf16.mxu0 %v3312_v50 }
 0x652   :  { %3170 = vmatpush3.bf16.msra.mxu0 %v3312_v50 }
 0x6f5   :  { %v3141_v28 = vpop.f32.mrf.mxu0 }
 0x6f6   :  { %v2234_v25 = vadd.f32 %v3141_v28, %v2611_v21 }
 0x6f7   :  { %v2225_v18 = vpop.f32.mrf.mxu0 }
 0x6f8   :  { %v2226_v23 = vadd.f32 %v2611_v21, %v2225_v18  ;;  %v2290_v35 = vmax.f32 %v2234_v25, 0.0 }
 0x6f9   :  { %v3142_v24 = vpop.f32.mrf.mxu0 }
 0x6fa   :  { %v2237_v27 = vadd.f32 %v3142_v24, %v2611_v21  ;;  %v2288_v30 = vmax.f32 %v2226_v23, 0.0 }
 0x6fb   :  { %v2228_v32 = vpop.f32.mrf.mxu0 }
 0x6fc   :  { %v2229_v29 = vadd.f32 %v2611_v21, %v2228_v32  ;;  %v2291_v20 = vmax.f32 %v2237_v27, 0.0 }
 0x6fd   :  { %v3145_v34 = vpop.f32.mrf.mxu0 }
 0x6fe   :  { %v2289_v33 = vmax.f32 %v2229_v29, 0.0  ;;  %v2305_v38 = vpack.c.bf16 %v2291_v20, %v2290_v35  ;;  %v2250_v46 = vadd.f32 %v3145_v34, %v2611_v21 }
 0x6ff   :  { %v2241_v36 = vpop.f32.mrf.mxu0 }
 0x700   :  { %v2304_v37 = vpack.c.bf16 %v2289_v33, %v2288_v30  ;;  %v2242_v40 = vadd.f32 %v2611_v21, %v2241_v36  ;;  %v2294_v51 = vmax.f32 %v2250_v46, 0.0 }
 0x701   :  { %v3146_v39 = vpop.f32.mrf.mxu0 }
 0x702   :  { %3171 = vmatprep.mubr.bf16.mxu0 %v2304_v37  ;;  %v2253_v45 = vadd.f32 %v3146_v39, %v2611_v21  ;;  %v2292_v48 = vmax.f32 %v2242_v40, 0.0 }
 0x703   :  { %3172 = vmatmul.mubr.bf16.vlgmr.msra.gmra.mxu0 %v2305_v38  ;;  %v2244_v47 = vpop.f32.mrf.mxu0 }
 0x704   :  { %v2245_v16 = vadd.f32 %v2611_v21, %v2244_v47  ;;  %v2295_v43 = vmax.f32 %v2253_v45, 0.0 }
 0x705   :  { %v3149_v17 = vpop.f32.mrf.mxu0 }
 0x706   :  { %v2293_v49 = vmax.f32 %v2245_v16, 0.0  ;;  %v2307_v53 = vpack.c.bf16 %v2295_v43, %v2294_v51  ;;  %v2266_v19 = vadd.f32 %v3149_v17, %v2611_v21 }
 0x707   :  { %v2257_v52 = vpop.f32.mrf.mxu0 }
 0x708   :  { %v2306_v31 = vpack.c.bf16 %v2293_v49, %v2292_v48  ;;  %v2258_v54 = vadd.f32 %v2611_v21, %v2257_v52  ;;  %v2298_v63 = vmax.f32 %v2266_v19, 0.0 }
 0x709   :  { %v3150_v42 = vpop.f32.mrf.mxu0 }
 0x70a   :  { %v2269_v44 = vadd.f32 %v3150_v42, %v2611_v21  ;;  %3175 = vmatprep.mubr.bf16.mxu1 %v2306_v31  ;;  %v2296_v61 = vmax.f32 %v2258_v54, 0.0 }
 0x70b   :  { %v2260_v55 = vpop.f32.mrf.mxu0  ;;  %3176 = vmatmul.mubr.bf16.vlgmr.msra.gmra.mxu1 %v2307_v53 }
 0x70c   :  { %v2261_v56 = vadd.f32 %v2611_v21, %v2260_v55  ;;  %v2299_v57 = vmax.f32 %v2269_v44, 0.0 }
 0x70d   :  { %v3153_v58 = vpop.f32.mrf.mxu0 }
 0x70e   :  { %v2297_v62 = vmax.f32 %v2261_v56, 0.0  ;;  %v2309_v2 = vpack.c.bf16 %v2299_v57, %v2298_v63  ;;  %v2282_v4 = vadd.f32 %v3153_v58, %v2611_v21 }
 0x70f   :  { %v2273_v0 = vpop.f32.mrf.mxu0 }
 0x710   :  { %v2308_v1 = vpack.c.bf16 %v2297_v62, %v2296_v61  ;;  %v2274_v59 = vadd.f32 %v2611_v21, %v2273_v0  ;;  %v2302_v8 = vmax.f32 %v2282_v4, 0.0 }
 0x711   :  { %v3154_v3 = vpop.f32.mrf.mxu0 }
 0x712   :  { %v2285_v60 = vadd.f32 %v3154_v3, %v2611_v21  ;;  %3179 = vmatprep.mubr.bf16.mxu1 %v2308_v1  ;;  %v2300_v7 = vmax.f32 %v2274_v59, 0.0 }
 0x713   :  { %v2276_v22 = vpop.f32.mrf.mxu0  ;;  %3180 = vmatmul.mubr.bf16.gmra.mxu1 %v2309_v2 }
 0x714   :  { %v2277_v5 = vadd.f32 %v2611_v21, %v2276_v22  ;;  %v2303_v6 = vmax.f32 %v2285_v60, 0.0 }
 0x716   :  { %v2301_v11 = vmax.f32 %v2277_v5, 0.0  ;;  %v2311_v41 = vpack.c.bf16 %v2303_v6, %v2302_v8 }
 0x718   :  { %v2310_v12 = vpack.c.bf16 %v2301_v11, %v2300_v7 }
 0x71a   :  { %3183 = vmatprep.mubr.bf16.mxu1 %v2310_v12 }
 0x71b   :  { %3184 = vmatmul.mubr.bf16.gmra.mxu1 %v2311_v41 }
 0x7c3   :  { %v3173_v26 = vpop.f32.mrf.mxu0 }
 0x7c4   :  { %v2426_v10 = vadd.f32 %v3173_v26, %v2620_v9 }
 0x7c5   :  { %v2417_v13 = vpop.f32.mrf.mxu0 }
 0x7c6   :  { %2482 = vst.msk [vmem:[%s4233_s24 + $0x10] sm:$0xff] %vm796_vm1, %v2426_v10  ;;  %v2418_v14 = vadd.f32 %v2620_v9, %v2417_v13 }
 0x7c7   :  { %v3174_v15 = vpop.f32.mrf.mxu0 }
 0x7c8   :  { %2480 = vst.msk [vmem:[%s4233_s24] sm:$0xff] %vm796_vm1, %v2418_v14  ;;  %v2429_v50 = vadd.f32 %v3174_v15, %v2620_v9 }
 0x7c9   :  { %v2420_v28 = vpop.f32.mrf.mxu0 }
 0x7ca   :  { %2483 = vst.msk [vmem:[%s4233_s24 + $0x18] sm:$0xff] %vm796_vm1, %v2429_v50  ;;  %v2421_v18 = vadd.f32 %v2620_v9, %v2420_v28 }
 0x7cb   :  { %v3177_v21 = vpop.f32.mrf.mxu1 }
 0x7cc   :  { %2481 = vst.msk [vmem:[%s4233_s24 + $0x8] sm:$0xff] %vm796_vm1, %v2421_v18  ;;  %v2442_v24 = vadd.f32 %v3177_v21, %v2620_v9 }
 0x7cd   :  { %v2433_v23 = vpop.f32.mrf.mxu1 }
 0x7ce   :  { %2486 = vst.msk [vmem:[%s4233_s24 + $0x30] sm:$0xff] %vm796_vm1, %v2442_v24  ;;  %v2434_v27 = vadd.f32 %v2620_v9, %v2433_v23 }
 0x7cf   :  { %v3178_v25 = vpop.f32.mrf.mxu1 }
 0x7d0   :  { %2484 = vst.msk [vmem:[%s4233_s24 + $0x20] sm:$0xff] %vm796_vm1, %v2434_v27  ;;  %v2445_v32 = vadd.f32 %v3178_v25, %v2620_v9 }
 0x7d1   :  { %v2436_v29 = vpop.f32.mrf.mxu1 }
 0x7d2   :  { %2487 = vst.msk [vmem:[%s4233_s24 + $0x38] sm:$0xff] %vm796_vm1, %v2445_v32  ;;  %v2437_v20 = vadd.f32 %v2620_v9, %v2436_v29 }
 0x7d3   :  { %v3181_v30 = vpop.f32.mrf.mxu1 }
 0x7d4   :  { %2485 = vst.msk [vmem:[%s4233_s24 + $0x28] sm:$0xff] %vm796_vm1, %v2437_v20  ;;  %v2458_v33 = vadd.f32 %v3181_v30, %v2620_v9 }
 0x7d5   :  { %v2449_v34 = vpop.f32.mrf.mxu1 }
 0x7d6   :  { %2490 = vst.msk [vmem:[%s4233_s24 + $0x50] sm:$0xff] %vm796_vm1, %v2458_v33  ;;  %v2450_v35 = vadd.f32 %v2620_v9, %v2449_v34 }
 0x7d7   :  { %v3182_v37 = vpop.f32.mrf.mxu1 }
 0x7d8   :  { %2488 = vst.msk [vmem:[%s4233_s24 + $0x40] sm:$0xff] %vm796_vm1, %v2450_v35  ;;  %v2461_v36 = vadd.f32 %v3182_v37, %v2620_v9 }
 0x7d9   :  { %v2452_v38 = vpop.f32.mrf.mxu1 }
 0x7da   :  { %2491 = vst.msk [vmem:[%s4233_s24 + $0x58] sm:$0xff] %vm796_vm1, %v2461_v36  ;;  %v2453_v39 = vadd.f32 %v2620_v9, %v2452_v38 }
 0x7db   :  { %v3185_v40 = vpop.f32.mrf.mxu1 }
 0x7dc   :  { %2489 = vst.msk [vmem:[%s4233_s24 + $0x48] sm:$0xff] %vm796_vm1, %v2453_v39  ;;  %v2474_v45 = vadd.f32 %v3185_v40, %v2620_v9 }
 0x7dd   :  { %v2465_v46 = vpop.f32.mrf.mxu1 }
 0x7de   :  { %2494 = vst.msk [vmem:[%s4233_s24 + $0x70] sm:$0xff] %vm796_vm1, %v2474_v45  ;;  %v2466_v47 = vadd.f32 %v2620_v9, %v2465_v46 }
 0x7df   :  { %v3186_v16 = vpop.f32.mrf.mxu1 }
 0x7e0   :  { %2492 = vst.msk [vmem:[%s4233_s24 + $0x60] sm:$0xff] %vm796_vm1, %v2466_v47  ;;  %v2477_v43 = vadd.f32 %v3186_v16, %v2620_v9 }
 0x7e1   :  { %v2468_v17 = vpop.f32.mrf.mxu1 }
 0x7e2   :  { %2495 = vst.msk [vmem:[%s4233_s24 + $0x78] sm:$0xff] %vm796_vm1, %v2477_v43  ;;  %v2469_v48 = vadd.f32 %v2620_v9, %v2468_v17 }
 0x7e4   :  { %2493 = vst.msk [vmem:[%s4233_s24 + $0x68] sm:$0xff] %vm796_vm1, %v2469_v48 }
 0x7e5   :  { %2508 = vsyncpa [#allocation3], 1 }
 0x7e6   :  { %2509 = vsyncpa [#allocation5], 1 }
 0x7e7   :  { %2510 = vsyncpa [#allocation8], 1 }
 0x7e8   :  { %2511 = vsyncpa [#allocation11], 1 }
 0x7e9   :  { %2512 = vsyncpa [#allocation14], 1 }
 0x7ea   :  { %2513 = vsyncpa [#allocation17], 1 }

</bundles_post_ra>
